<compile_context>
chip_gen: v7x
topology: tpu7x:2x2x1
jax: 0.10.0
libtpu: 0.0.40
codegen_flags: <defaults>
</compile_context>

<pallas_src>
import jax
import jax.numpy as jnp
from jax.experimental import pallas as pl
from jax.experimental.pallas import tpu as pltpu

_VMEM = pl.BlockSpec(memory_space=pltpu.MemorySpace.VMEM)


# ---------------------------------------------------------------------------
# Kernels
# ---------------------------------------------------------------------------
def _conv_pool_kernel(p_ref, w_ref, b_ref, o_ref):
    """Fused conv-as-GEMM + bias + ReLU + 2x2 max-pool.

    p_ref: (4, R, K)  im2col patches; leading axis = position inside the 2x2
                      pool window, R = N*Hp*Wp pooled output positions.
    w_ref: (K, C)     conv weight, K = Cin*kh*kw (PyTorch feature order).
    b_ref: (1, C)     conv bias.
    o_ref: (R, C)     pooled, ReLU'd activations (rows = (n, ph, pw), NHWC).
    """
    w = w_ref[...]
    b = b_ref[...]
    acc = None
    for k in range(4):  # static unroll over the 4 pool-window positions
        h = jnp.dot(p_ref[k], w, preferred_element_type=jnp.float32) + b
        acc = h if acc is None else jnp.maximum(acc, h)
    # relu(max_k(conv_k + b)) == maxpool(relu(conv + b)): ReLU and max commute.
    o_ref[...] = jnp.maximum(acc, 0.0)


def _head_kernel(x_ref, g_ref, beta_ref, w1_ref, b1_ref, w2_ref, b2_ref, o_ref):
    """Fused LayerNorm(256) + lin1 + ReLU + lin2 (lane-dense padded output)."""
    x = x_ref[...]                                        # (2, 256)
    mu = jnp.mean(x, axis=-1, keepdims=True)
    xc = x - mu
    var = jnp.mean(xc * xc, axis=-1, keepdims=True)       # biased, as PyTorch LN
    xn = xc * jax.lax.rsqrt(var + 1e-5)
    xn = xn * g_ref[...] + beta_ref[...]
    h = jnp.dot(xn, w1_ref[...], preferred_element_type=jnp.float32) + b1_ref[...]
    h = jnp.maximum(h, 0.0)
    # TODO(synk): nn.Dropout(p=0.2) is identity at inference; training-mode
    # dropout would use pltpu.prng_seed / pltpu.prng_random_bits here.
    o_ref[...] = jnp.dot(h, w2_ref[...],
                         preferred_element_type=jnp.float32) + b2_ref[...]


# ---------------------------------------------------------------------------
# pallas_call wrappers
# ---------------------------------------------------------------------------
def _conv_pool(p, w, b):
    _, r, k = p.shape
    c = w.shape[1]
    nbytes = 4 * (p.size + w.size + b.size + r * c)
    return pl.pallas_call(
        _conv_pool_kernel,
        out_shape=jax.ShapeDtypeStruct((r, c), jnp.float32),
        in_specs=[_VMEM, _VMEM, _VMEM],
        out_specs=_VMEM,
        cost_estimate=pl.CostEstimate(flops=2 * 4 * r * k * c,
                                      transcendentals=0,
                                      bytes_accessed=nbytes),
    )(p, w, b)


def _head(x, kp):
    nbytes = 4 * (x.size + kp["ln_g"].size + kp["ln_b"].size + kp["w_l1"].size
                  + kp["b_l1"].size + kp["w_l2"].size + kp["b_l2"].size
                  + 2 * 128)
    flops = 2 * 2 * 256 * 128 + 2 * 2 * 128 * 128 + 8 * 2 * 256
    return pl.pallas_call(
        _head_kernel,
        out_shape=jax.ShapeDtypeStruct((2, 128), jnp.float32),
        in_specs=[_VMEM] * 7,
        out_specs=_VMEM,
        cost_estimate=pl.CostEstimate(flops=flops, transcendentals=2,
                                      bytes_accessed=nbytes),
    )(x, kp["ln_g"], kp["ln_b"], kp["w_l1"], kp["b_l1"], kp["w_l2"], kp["b_l2"])


# ---------------------------------------------------------------------------
# Wrapper glue (pure XLA data rearrangement, zero FLOPs)
# ---------------------------------------------------------------------------
def _im2col_pool_groups(x, kh, kw):
    """x: (N, Cin, H, W) -> (4, N*Hp*Wp, Cin*kh*kw), grouped by pool window.

    Feature order is (cin, kh, kw), matching PyTorch conv weight.reshape(Cout,-1).
    Leading axis enumerates the 2x2 max-pool window position (dy*2 + dx).
    """
    n, cin, h, w = x.shape
    ho, wo = h - kh + 1, w - kw + 1
    hp, wp = ho // 2, wo // 2
    cols = [x[:, :, i:i + ho, j:j + wo] for i in range(kh) for j in range(kw)]
    p = jnp.stack(cols, axis=2)                   # (N, Cin, kh*kw, Ho, Wo)
    p = p.reshape(n, cin * kh * kw, ho, wo)       # feature order (cin, i, j)
    p = p.transpose(0, 2, 3, 1)                   # (N, Ho, Wo, K)
    p = p.reshape(n, hp, 2, wp, 2, cin * kh * kw)
    p = p.transpose(2, 4, 0, 1, 3, 5)             # (dy, dx, N, Hp, Wp, K)
    return p.reshape(4, n * hp * wp, cin * kh * kw)


def net_forward(x, kp):
    """x: (1, 2, 28, 28) float32 -> (2, 10) float32 digit logits."""
    x = jnp.squeeze(x, axis=0).reshape(2, 1, 28, 28).astype(jnp.float32)
    p1 = _im2col_pool_groups(x, 5, 5)                     # (4, 288, 25)
    h1 = _conv_pool(p1, kp["w_c1"], kp["b_c1"])           # (288, 6)
    x1 = h1.reshape(2, 12, 12, 6).transpose(0, 3, 1, 2)   # (2, 6, 12, 12)
    p2 = _im2col_pool_groups(x1, 5, 5)                    # (4, 32, 150)
    h2 = _conv_pool(p2, kp["w_c2"], kp["b_c2"])           # (32, 16)
    # NCHW flatten (2,16,4,4) -> (2,256), matching PyTorch's x.reshape(2, -1)
    feat = h2.reshape(2, 4, 4, 16).transpose(0, 3, 1, 2).reshape(2, 256)
    y = _head(feat, kp)                                   # (2, 128) lane-dense
    return y[:, :10]


net_forward_jit = jax.jit(net_forward)


# ---------------------------------------------------------------------------
# Parameters
# ---------------------------------------------------------------------------
def init_params(key):
    """PyTorch-layout parameters with nn.Linear/Conv2d default-style init."""
    ks = jax.random.split(key, 8)

    def u(k, shape, fan_in):
        bound = 1.0 / jnp.sqrt(float(fan_in))
        return jax.random.uniform(k, shape, jnp.float32, -bound, bound)

    return dict(
        conv1_w=u(ks[0], (6, 1, 5, 5), 25), conv1_b=u(ks[1], (6,), 25),
        conv2_w=u(ks[2], (16, 6, 5, 5), 150), conv2_b=u(ks[3], (16,), 150),
        ln_g=jnp.ones((256,), jnp.float32), ln_b=jnp.zeros((256,), jnp.float32),
        lin1_w=u(ks[4], (128, 256), 256), lin1_b=u(ks[5], (128,), 256),
        lin2_w=u(ks[6], (10, 128), 128), lin2_b=u(ks[7], (10,), 128),
    )


def prepare_params(p):
    """One-time transform of PyTorch-layout params into kernel-ready layouts:
    weights as (in, out), biases as (1, out), lin2 zero-padded to 128 output
    lanes so the final store is a full unmasked vreg write."""
    w_l2 = jnp.zeros((128, 128), jnp.float32).at[:, :10].set(p["lin2_w"].T)
    b_l2 = jnp.zeros((1, 128), jnp.float32).at[:, :10].set(p["lin2_b"][None, :])
    return dict(
        w_c1=p["conv1_w"].reshape(6, 25).T, b_c1=p["conv1_b"][None, :],
        w_c2=p["conv2_w"].reshape(16, 150).T, b_c2=p["conv2_b"][None, :],
        ln_g=p["ln_g"][None, :], ln_b=p["ln_b"][None, :],
        w_l1=p["lin1_w"].T, b_l1=p["lin1_b"][None, :],
        w_l2=w_l2, b_l2=b_l2,
    )


# ---------------------------------------------------------------------------
# Pure-JAX reference (same semantics, XLA ops) and self-check
# ---------------------------------------------------------------------------
def reference_forward(x, p):
    x = jnp.squeeze(x, axis=0).reshape(2, 1, 28, 28)
    dn = ("NCHW", "OIHW", "NCHW")
    y = jax.lax.conv_general_dilated(x, p["conv1_w"], (1, 1), "VALID",
                                     dimension_numbers=dn)
    y = jnp.maximum(y + p["conv1_b"].reshape(1, 6, 1, 1), 0.0)
    y = jax.lax.reduce_window(y, -jnp.inf, jax.lax.max,
                              (1, 1, 2, 2), (1, 1, 2, 2), "VALID")
    y = jax.lax.conv_general_dilated(y, p["conv2_w"], (1, 1), "VALID",
                                     dimension_numbers=dn)
    y = jnp.maximum(y + p["conv2_b"].reshape(1, 16, 1, 1), 0.0)
    y = jax.lax.reduce_window(y, -jnp.inf, jax.lax.max,
                              (1, 1, 2, 2), (1, 1, 2, 2), "VALID")
    y = y.reshape(2, -1)
    mu = y.mean(-1, keepdims=True)
    var = ((y - mu) ** 2).mean(-1, keepdims=True)
    y = (y - mu) / jnp.sqrt(var + 1e-5) * p["ln_g"] + p["ln_b"]
    y = jnp.maximum(y @ p["lin1_w"].T + p["lin1_b"], 0.0)
    return y @ p["lin2_w"].T + p["lin2_b"]


if __name__ == "__main__":
    key = jax.random.PRNGKey(0)
    k_data, k_params = jax.random.split(key)

    params = init_params(k_params)
    kparams = prepare_params(params)
    x = jax.random.normal(k_data, (1, 2, 28, 28), jnp.float32)

    y = net_forward_jit(x, kparams)
    jax.block_until_ready(y)

    ref = reference_forward(x, params)
    assert y.shape == (2, 10), y.shape
    max_err = float(jnp.max(jnp.abs(y - ref)))
    assert jnp.allclose(y, ref, atol=1e-3, rtol=1e-3), f"max |err| = {max_err}"

    print("KERNEL_OK")
</pallas_src>

<mosaic_0001>
module attributes {stable_mosaic.version = 11 : i64} {
  func.func @_conv_pool_kernel(%arg0: memref<4x288x25xf32, #tpu.memory_space<vmem>>, %arg1: memref<25x6xf32, #tpu.memory_space<vmem>>, %arg2: memref<1x6xf32, #tpu.memory_space<vmem>>, %arg3: memref<288x6xf32, #tpu.memory_space<vmem>>) attributes {dimension_semantics = [], scalar_prefetch = 0 : i64, scratch_operands = 0 : i64, tpu.core_type = #tpu.core_type<tc>} {
    %c0 = arith.constant 0 : index
    %c0_0 = arith.constant 0 : index
    %0 = vector.load %arg1[%c0, %c0_0] : memref<25x6xf32, #tpu.memory_space<vmem>>, vector<25x6xf32>
    %c0_1 = arith.constant 0 : index
    %c0_2 = arith.constant 0 : index
    %1 = vector.load %arg2[%c0_1, %c0_2] : memref<1x6xf32, #tpu.memory_space<vmem>>, vector<1x6xf32>
    %c0_3 = arith.constant 0 : index
    %c0_4 = arith.constant 0 : index
    %c0_5 = arith.constant 0 : index
    %2 = vector.load %arg0[%c0_3, %c0_4, %c0_5] : memref<4x288x25xf32, #tpu.memory_space<vmem>>, vector<1x288x25xf32>
    %3 = vector.shape_cast %2 : vector<1x288x25xf32> to vector<288x25xf32>
    %cst = arith.constant dense<0.000000e+00> : vector<288x6xf32>
    %4 = tpu.matmul %3, %0, %cst {dimension_numbers = #tpu.dot_dimension_numbers<[1], [0], [0], [1], [0, 0, 1, 1], [], []>} : vector<288x25xf32>, vector<25x6xf32>, vector<288x6xf32> -> vector<288x6xf32>
    %5 = vector.broadcast %1 : vector<1x6xf32> to vector<288x6xf32>
    %6 = arith.addf %4, %5 : vector<288x6xf32>
    %c1 = arith.constant 1 : index
    %c0_6 = arith.constant 0 : index
    %c0_7 = arith.constant 0 : index
    %7 = vector.load %arg0[%c1, %c0_6, %c0_7] : memref<4x288x25xf32, #tpu.memory_space<vmem>>, vector<1x288x25xf32>
    %8 = vector.shape_cast %7 : vector<1x288x25xf32> to vector<288x25xf32>
    %cst_8 = arith.constant dense<0.000000e+00> : vector<288x6xf32>
    %9 = tpu.matmul %8, %0, %cst_8 {dimension_numbers = #tpu.dot_dimension_numbers<[1], [0], [0], [1], [0, 0, 1, 1], [], []>} : vector<288x25xf32>, vector<25x6xf32>, vector<288x6xf32> -> vector<288x6xf32>
    %10 = vector.broadcast %1 : vector<1x6xf32> to vector<288x6xf32>
    %11 = arith.addf %9, %10 : vector<288x6xf32>
    %12 = arith.maximumf %6, %11 : vector<288x6xf32>
    %c2 = arith.constant 2 : index
    %c0_9 = arith.constant 0 : index
    %c0_10 = arith.constant 0 : index
    %13 = vector.load %arg0[%c2, %c0_9, %c0_10] : memref<4x288x25xf32, #tpu.memory_space<vmem>>, vector<1x288x25xf32>
    %14 = vector.shape_cast %13 : vector<1x288x25xf32> to vector<288x25xf32>
    %cst_11 = arith.constant dense<0.000000e+00> : vector<288x6xf32>
    %15 = tpu.matmul %14, %0, %cst_11 {dimension_numbers = #tpu.dot_dimension_numbers<[1], [0], [0], [1], [0, 0, 1, 1], [], []>} : vector<288x25xf32>, vector<25x6xf32>, vector<288x6xf32> -> vector<288x6xf32>
    %16 = vector.broadcast %1 : vector<1x6xf32> to vector<288x6xf32>
    %17 = arith.addf %15, %16 : vector<288x6xf32>
    %18 = arith.maximumf %12, %17 : vector<288x6xf32>
    %c3 = arith.constant 3 : index
    %c0_12 = arith.constant 0 : index
    %c0_13 = arith.constant 0 : index
    %19 = vector.load %arg0[%c3, %c0_12, %c0_13] : memref<4x288x25xf32, #tpu.memory_space<vmem>>, vector<1x288x25xf32>
    %20 = vector.shape_cast %19 : vector<1x288x25xf32> to vector<288x25xf32>
    %cst_14 = arith.constant dense<0.000000e+00> : vector<288x6xf32>
    %21 = tpu.matmul %20, %0, %cst_14 {dimension_numbers = #tpu.dot_dimension_numbers<[1], [0], [0], [1], [0, 0, 1, 1], [], []>} : vector<288x25xf32>, vector<25x6xf32>, vector<288x6xf32> -> vector<288x6xf32>
    %22 = vector.broadcast %1 : vector<1x6xf32> to vector<288x6xf32>
    %23 = arith.addf %21, %22 : vector<288x6xf32>
    %24 = arith.maximumf %18, %23 : vector<288x6xf32>
    %cst_15 = arith.constant 0.000000e+00 : f32
    %25 = vector.broadcast %cst_15 : f32 to vector<288x6xf32>
    %26 = arith.maximumf %24, %25 : vector<288x6xf32>
    %c0_16 = arith.constant 0 : index
    %c0_17 = arith.constant 0 : index
    %27 = vector.load %arg3[%c0_16, %c0_17] : memref<288x6xf32, #tpu.memory_space<vmem>>, vector<288x6xf32>
    tpu.vector_store %arg3[%c0_16, %c0_17], %26 {strides = array<i32>} : memref<288x6xf32, #tpu.memory_space<vmem>>, vector<288x6xf32>,
    return
  }
}

module attributes {stable_mosaic.version = 11 : i64} {
  func.func @_conv_pool_kernel(%arg0: memref<4x32x150xf32, #tpu.memory_space<vmem>>, %arg1: memref<150x16xf32, #tpu.memory_space<vmem>>, %arg2: memref<1x16xf32, #tpu.memory_space<vmem>>, %arg3: memref<32x16xf32, #tpu.memory_space<vmem>>) attributes {dimension_semantics = [], scalar_prefetch = 0 : i64, scratch_operands = 0 : i64, tpu.core_type = #tpu.core_type<tc>} {
    %c0 = arith.constant 0 : index
    %c0_0 = arith.constant 0 : index
    %0 = vector.load %arg1[%c0, %c0_0] : memref<150x16xf32, #tpu.memory_space<vmem>>, vector<150x16xf32>
    %c0_1 = arith.constant 0 : index
    %c0_2 = arith.constant 0 : index
    %1 = vector.load %arg2[%c0_1, %c0_2] : memref<1x16xf32, #tpu.memory_space<vmem>>, vector<1x16xf32>
    %c0_3 = arith.constant 0 : index
    %c0_4 = arith.constant 0 : index
    %c0_5 = arith.constant 0 : index
    %2 = vector.load %arg0[%c0_3, %c0_4, %c0_5] : memref<4x32x150xf32, #tpu.memory_space<vmem>>, vector<1x32x150xf32>
    %3 = vector.shape_cast %2 : vector<1x32x150xf32> to vector<32x150xf32>
    %cst = arith.constant dense<0.000000e+00> : vector<32x16xf32>
    %4 = tpu.matmul %3, %0, %cst {dimension_numbers = #tpu.dot_dimension_numbers<[1], [0], [0], [1], [0, 0, 1, 1], [], []>} : vector<32x150xf32>, vector<150x16xf32>, vector<32x16xf32> -> vector<32x16xf32>
    %5 = vector.broadcast %1 : vector<1x16xf32> to vector<32x16xf32>
    %6 = arith.addf %4, %5 : vector<32x16xf32>
    %c1 = arith.constant 1 : index
    %c0_6 = arith.constant 0 : index
    %c0_7 = arith.constant 0 : index
    %7 = vector.load %arg0[%c1, %c0_6, %c0_7] : memref<4x32x150xf32, #tpu.memory_space<vmem>>, vector<1x32x150xf32>
    %8 = vector.shape_cast %7 : vector<1x32x150xf32> to vector<32x150xf32>
    %cst_8 = arith.constant dense<0.000000e+00> : vector<32x16xf32>
    %9 = tpu.matmul %8, %0, %cst_8 {dimension_numbers = #tpu.dot_dimension_numbers<[1], [0], [0], [1], [0, 0, 1, 1], [], []>} : vector<32x150xf32>, vector<150x16xf32>, vector<32x16xf32> -> vector<32x16xf32>
    %10 = vector.broadcast %1 : vector<1x16xf32> to vector<32x16xf32>
    %11 = arith.addf %9, %10 : vector<32x16xf32>
    %12 = arith.maximumf %6, %11 : vector<32x16xf32>
    %c2 = arith.constant 2 : index
    %c0_9 = arith.constant 0 : index
    %c0_10 = arith.constant 0 : index
    %13 = vector.load %arg0[%c2, %c0_9, %c0_10] : memref<4x32x150xf32, #tpu.memory_space<vmem>>, vector<1x32x150xf32>
    %14 = vector.shape_cast %13 : vector<1x32x150xf32> to vector<32x150xf32>
    %cst_11 = arith.constant dense<0.000000e+00> : vector<32x16xf32>
    %15 = tpu.matmul %14, %0, %cst_11 {dimension_numbers = #tpu.dot_dimension_numbers<[1], [0], [0], [1], [0, 0, 1, 1], [], []>} : vector<32x150xf32>, vector<150x16xf32>, vector<32x16xf32> -> vector<32x16xf32>
    %16 = vector.broadcast %1 : vector<1x16xf32> to vector<32x16xf32>
    %17 = arith.addf %15, %16 : vector<32x16xf32>
    %18 = arith.maximumf %12, %17 : vector<32x16xf32>
    %c3 = arith.constant 3 : index
    %c0_12 = arith.constant 0 : index
    %c0_13 = arith.constant 0 : index
    %19 = vector.load %arg0[%c3, %c0_12, %c0_13] : memref<4x32x150xf32, #tpu.memory_space<vmem>>, vector<1x32x150xf32>
    %20 = vector.shape_cast %19 : vector<1x32x150xf32> to vector<32x150xf32>
    %cst_14 = arith.constant dense<0.000000e+00> : vector<32x16xf32>
    %21 = tpu.matmul %20, %0, %cst_14 {dimension_numbers = #tpu.dot_dimension_numbers<[1], [0], [0], [1], [0, 0, 1, 1], [], []>} : vector<32x150xf32>, vector<150x16xf32>, vector<32x16xf32> -> vector<32x16xf32>
    %22 = vector.broadcast %1 : vector<1x16xf32> to vector<32x16xf32>
    %23 = arith.addf %21, %22 : vector<32x16xf32>
    %24 = arith.maximumf %18, %23 : vector<32x16xf32>
    %cst_15 = arith.constant 0.000000e+00 : f32
    %25 = vector.broadcast %cst_15 : f32 to vector<32x16xf32>
    %26 = arith.maximumf %24, %25 : vector<32x16xf32>
    %c0_16 = arith.constant 0 : index
    %c0_17 = arith.constant 0 : index
    %27 = vector.load %arg3[%c0_16, %c0_17] : memref<32x16xf32, #tpu.memory_space<vmem>>, vector<32x16xf32>
    tpu.vector_store %arg3[%c0_16, %c0_17], %26 {strides = array<i32>} : memref<32x16xf32, #tpu.memory_space<vmem>>, vector<32x16xf32>,
    return
  }
}

module attributes {stable_mosaic.version = 11 : i64} {
  func.func @_head_kernel(%arg0: memref<2x256xf32, #tpu.memory_space<vmem>>, %arg1: memref<1x256xf32, #tpu.memory_space<vmem>>, %arg2: memref<1x256xf32, #tpu.memory_space<vmem>>, %arg3: memref<256x128xf32, #tpu.memory_space<vmem>>, %arg4: memref<1x128xf32, #tpu.memory_space<vmem>>, %arg5: memref<128x128xf32, #tpu.memory_space<vmem>>, %arg6: memref<1x128xf32, #tpu.memory_space<vmem>>, %arg7: memref<2x128xf32, #tpu.memory_space<vmem>>) attributes {dimension_semantics = [], scalar_prefetch = 0 : i64, scratch_operands = 0 : i64, tpu.core_type = #tpu.core_type<tc>} {
    %c0 = arith.constant 0 : index
    %c0_0 = arith.constant 0 : index
    %0 = vector.load %arg0[%c0, %c0_0] : memref<2x256xf32, #tpu.memory_space<vmem>>, vector<2x256xf32>
    %cst = arith.constant dense<0.000000e+00> : vector<2xf32>
    %1 = vector.multi_reduction <add>, %0, %cst [1] : vector<2x256xf32> to vector<2xf32>
    %2 = vector.shape_cast %1 : vector<2xf32> to vector<2x1xf32>
    %cst_1 = arith.constant 2.560000e+02 : f32
    %3 = vector.broadcast %cst_1 : f32 to vector<2x1xf32>
    %4 = arith.divf %2, %3 : vector<2x1xf32>
    %5 = vector.broadcast %4 : vector<2x1xf32> to vector<2x256xf32>
    %6 = arith.subf %0, %5 : vector<2x256xf32>
    %7 = arith.mulf %6, %6 : vector<2x256xf32>
    %cst_2 = arith.constant dense<0.000000e+00> : vector<2xf32>
    %8 = vector.multi_reduction <add>, %7, %cst_2 [1] : vector<2x256xf32> to vector<2xf32>
    %9 = vector.shape_cast %8 : vector<2xf32> to vector<2x1xf32>
    %cst_3 = arith.constant 2.560000e+02 : f32
    %10 = vector.broadcast %cst_3 : f32 to vector<2x1xf32>
    %11 = arith.divf %9, %10 : vector<2x1xf32>
    %cst_4 = arith.constant 9.99999974E-6 : f32
    %12 = vector.broadcast %cst_4 : f32 to vector<2x1xf32>
    %13 = arith.addf %11, %12 : vector<2x1xf32>
    %14 = math.rsqrt %13 : vector<2x1xf32>
    %15 = vector.broadcast %14 : vector<2x1xf32> to vector<2x256xf32>
    %16 = arith.mulf %6, %15 : vector<2x256xf32>
    %c0_5 = arith.constant 0 : index
    %c0_6 = arith.constant 0 : index
    %17 = vector.load %arg1[%c0_5, %c0_6] : memref<1x256xf32, #tpu.memory_space<vmem>>, vector<1x256xf32>
    %18 = vector.broadcast %17 : vector<1x256xf32> to vector<2x256xf32>
    %19 = arith.mulf %16, %18 : vector<2x256xf32>
    %c0_7 = arith.constant 0 : index
    %c0_8 = arith.constant 0 : index
    %20 = vector.load %arg2[%c0_7, %c0_8] : memref<1x256xf32, #tpu.memory_space<vmem>>, vector<1x256xf32>
    %21 = vector.broadcast %20 : vector<1x256xf32> to vector<2x256xf32>
    %22 = arith.addf %19, %21 : vector<2x256xf32>
    %c0_9 = arith.constant 0 : index
    %c0_10 = arith.constant 0 : index
    %23 = vector.load %arg3[%c0_9, %c0_10] : memref<256x128xf32, #tpu.memory_space<vmem>>, vector<256x128xf32>
    %cst_11 = arith.constant dense<0.000000e+00> : vector<2x128xf32>
    %24 = tpu.matmul %22, %23, %cst_11 {dimension_numbers = #tpu.dot_dimension_numbers<[1], [0], [0], [1], [0, 0, 1, 1], [], []>} : vector<2x256xf32>, vector<256x128xf32>, vector<2x128xf32> -> vector<2x128xf32>
    %c0_12 = arith.constant 0 : index
    %c0_13 = arith.constant 0 : index
    %25 = vector.load %arg4[%c0_12, %c0_13] : memref<1x128xf32, #tpu.memory_space<vmem>>, vector<1x128xf32>
    %26 = vector.broadcast %25 : vector<1x128xf32> to vector<2x128xf32>
    %27 = arith.addf %24, %26 : vector<2x128xf32>
    %cst_14 = arith.constant 0.000000e+00 : f32
    %28 = vector.broadcast %cst_14 : f32 to vector<2x128xf32>
    %29 = arith.maximumf %27, %28 : vector<2x128xf32>
    %c0_15 = arith.constant 0 : index
    %c0_16 = arith.constant 0 : index
    %30 = vector.load %arg5[%c0_15, %c0_16] : memref<128x128xf32, #tpu.memory_space<vmem>>, vector<128x128xf32>
    %cst_17 = arith.constant dense<0.000000e+00> : vector<2x128xf32>
    %31 = tpu.matmul %29, %30, %cst_17 {dimension_numbers = #tpu.dot_dimension_numbers<[1], [0], [0], [1], [0, 0, 1, 1], [], []>} : vector<2x128xf32>, vector<128x128xf32>, vector<2x128xf32> -> vector<2x128xf32>
    %c0_18 = arith.constant 0 : index
    %c0_19 = arith.constant 0 : index
    %32 = vector.load %arg6[%c0_18, %c0_19] : memref<1x128xf32, #tpu.memory_space<vmem>>, vector<1x128xf32>
    %33 = vector.broadcast %32 : vector<1x128xf32> to vector<2x128xf32>
    %34 = arith.addf %31, %33 : vector<2x128xf32>
    %c0_20 = arith.constant 0 : index
    %c0_21 = arith.constant 0 : index
    %35 = vector.load %arg7[%c0_20, %c0_21] : memref<2x128xf32, #tpu.memory_space<vmem>>, vector<2x128xf32>
    tpu.vector_store %arg7[%c0_20, %c0_21], %34 {strides = array<i32>} : memref<2x128xf32, #tpu.memory_space<vmem>>, vector<2x128xf32>,
    return
  }
}

</mosaic_0001>

<bundles_post_ra>
// kernel: net_forward.3
= control target key start
LH: loop header
LB: loop body
LE: loop exit
PB: predicated region body
PF: predicated region fallthrough
CT: control target
= control target key end

     0   :  { %vm170_vm0 = vcmask 1040384   ;;  %vm61_vm1 = vcmask 203776   ;;  %vm2480_vm2 = vmmov 1   ;;  %vm1733_vm4 = vcmask 48128   ;;  %s3726_s1 = inlined_call_operand.vmem [shape: f32[25,6], index: 1, kind: input, shape index: {}]   ;;  %s3727_s0 = inlined_call_operand.vmem [shape: f32[4,288,25], index: 0, kind: input, shape index: {}]   ;;  %s3728_s2 = inlined_call_operand.vmem [shape: f32[1,6], index: 2, kind: input, shape index: {}]   ;;  %s3729_s3 = inlined_call_operand.vmem [shape: f32[288,6], index: 3, kind: output, shape index: {}]  }
   0x1   :  { %v14_v0 = vld [vmem:[%s3726_s1] sm:$0xff]  ;;  %v15_v1 = vld [vmem:[%s3726_s1 + $0x8] sm:$0xff]  ;;  %v16_v2 = vld [vmem:[%s3726_s1 + $0x10] sm:$0xff] }
   0x2   :  { %v2439_v3 = vpack.c.bf16 %v15_v1, %v14_v0  ;;  %v17_v4 = vld [vmem:[%s3726_s1 + $0x18] sm:$0x1]  ;;  %v19_v5 = vld [vmem:[%s3727_s0] sm:$0xff]  ;;  %vm2516_vm3 = vmpackc.low %vm170_vm0, %vm2480_vm2 }
   0x3   :  { %v2443_v6 = vpack.c.bf16 %v17_v4, %v16_v2  ;;  %2199 = vmatprep.mubr.msk.f32.mxu0 %vm61_vm1, %v19_v5  ;;  %v1812_v8 = vld [vmem:[%s3727_s0 + $0x120] sm:$0xff]  ;;  %v20_v9 = vld [vmem:[%s3727_s0 + $0x8] sm:$0xff]  ;;  %v21_v11 = vld [vmem:[%s3727_s0 + $0x10] sm:$0xff] }
   0x4   :  { %2440 = vmatprep.subr.bf16.mxu0 %v2439_v3  ;;  %2450 = vmatprep.subr.bf16.mxu1 %v2439_v3  ;;  %v1813_v10 = vld [vmem:[%s3727_s0 + $0x128] sm:$0xff]  ;;  %v1814_v12 = vld [vmem:[%s3727_s0 + $0x130] sm:$0xff]  ;;  %v22_v13 = vld [vmem:[%s3727_s0 + $0x18] sm:$0xff] }
   0x5   :  { %2442 = vmatpush3.bf16.msra.mxu0 %v2439_v3  ;;  %2452 = vmatpush3.bf16.msra.mxu1 %v2439_v3  ;;  %v1815_v14 = vld [vmem:[%s3727_s0 + $0x138] sm:$0xff]  ;;  %v23_v15 = vld [vmem:[%s3727_s0 + $0x20] sm:$0xff]  ;;  %v24_v17 = vld [vmem:[%s3727_s0 + $0x28] sm:$0xff] }
   0x6   :  { %2445 = vmatprep.subr.msk.bf16.mxu0 %vm2516_vm3, %v2443_v6  ;;  %2455 = vmatprep.subr.msk.bf16.mxu1 %vm2516_vm3, %v2443_v6  ;;  %v1816_v16 = vld [vmem:[%s3727_s0 + $0x140] sm:$0xff]  ;;  %v1817_v18 = vld [vmem:[%s3727_s0 + $0x148] sm:$0xff]  ;;  %v25_v19 = vld [vmem:[%s3727_s0 + $0x30] sm:$0xff] }
   0x7   :  { %2261 = vmatprep.mubr.msk.f32.mxu1 %vm61_vm1, %v1812_v8  ;;  %v1818_v20 = vld [vmem:[%s3727_s0 + $0x150] sm:$0xff]  ;;  %v26_v21 = vld [vmem:[%s3727_s0 + $0x38] sm:$0xff]  ;;  %v27_v23 = vld [vmem:[%s3727_s0 + $0x40] sm:$0xff] }
   0x8   :  { %v1819_v22 = vld [vmem:[%s3727_s0 + $0x158] sm:$0xff]  ;;  %v1820_v24 = vld [vmem:[%s3727_s0 + $0x160] sm:$0xff]  ;;  %v28_v25 = vld [vmem:[%s3727_s0 + $0x48] sm:$0xff] }
   0x9   :  { %2448 = vmatpush3.bf16.msk.msra.mxu0 %vm2516_vm3, %v2443_v6  ;;  %2458 = vmatpush3.bf16.msk.msra.mxu1 %vm2516_vm3, %v2443_v6  ;;  %v1821_v26 = vld [vmem:[%s3727_s0 + $0x168] sm:$0xff]  ;;  %v29_v27 = vld [vmem:[%s3727_s0 + $0x50] sm:$0xff]  ;;  %v30_v29 = vld [vmem:[%s3727_s0 + $0x58] sm:$0xff] }
   0xa   :  { %2460 = vmatprep.subr.bf16.mxu0 %v2439_v3  ;;  %2470 = vmatprep.subr.bf16.mxu1 %v2439_v3  ;;  %v1822_v28 = vld [vmem:[%s3727_s0 + $0x170] sm:$0xff]  ;;  %v1823_v30 = vld [vmem:[%s3727_s0 + $0x178] sm:$0xff]  ;;  %v31_v31 = vld [vmem:[%s3727_s0 + $0x60] sm:$0xff] }
   0xb   :  { %v1824_v32 = vld [vmem:[%s3727_s0 + $0x180] sm:$0xff]  ;;  %v32_v33 = vld [vmem:[%s3727_s0 + $0x68] sm:$0xff]  ;;  %v33_v35 = vld [vmem:[%s3727_s0 + $0x70] sm:$0xff] }
   0xc   :  { %2200 = vmatmul.mubr.msk.f32.vlgmr.msra.gmra.mrb[0].mxu0 %vm61_vm1, %v20_v9  ;;  %2262 = vmatmul.mubr.msk.f32.vlgmr.msra.gmra.mrb[0].mxu1 %vm61_vm1, %v1813_v10  ;;  %v1825_v34 = vld [vmem:[%s3727_s0 + $0x188] sm:$0xff]  ;;  %v1826_v36 = vld [vmem:[%s3727_s0 + $0x190] sm:$0xff]  ;;  %v34_v37 = vld [vmem:[%s3727_s0 + $0x78] sm:$0xff] }
   0xd   :  { %2462 = vmatpush3.bf16.msra.mxu0 %v2439_v3  ;;  %2202 = vmatprep.mubr.msk.f32.mxu0 %vm61_vm1, %v21_v11  ;;  %v1827_v38 = vld [vmem:[%s3727_s0 + $0x198] sm:$0xff]  ;;  %v35_v39 = vld [vmem:[%s3727_s0 + $0x80] sm:$0xff]  ;;  %v36_v41 = vld [vmem:[%s3727_s0 + $0x88] sm:$0xff] }
   0xe   :  { %2264 = vmatprep.mubr.msk.f32.mxu1 %vm61_vm1, %v1814_v12  ;;  %2472 = vmatpush3.bf16.msra.mxu1 %v2439_v3  ;;  %v1828_v40 = vld [vmem:[%s3727_s0 + $0x1a0] sm:$0xff]  ;;  %v1829_v42 = vld [vmem:[%s3727_s0 + $0x1a8] sm:$0xff]  ;;  %v37_v43 = vld [vmem:[%s3727_s0 + $0x90] sm:$0xff] }
   0xf   :  { %2465 = vmatprep.subr.msk.bf16.mxu0 %vm2516_vm3, %v2443_v6  ;;  %2475 = vmatprep.subr.msk.bf16.mxu1 %vm2516_vm3, %v2443_v6  ;;  %v1830_v44 = vld [vmem:[%s3727_s0 + $0x1b0] sm:$0xff]  ;;  %v38_v45 = vld [vmem:[%s3727_s0 + $0x98] sm:$0xff]  ;;  %v39_v47 = vld [vmem:[%s3727_s0 + $0xa0] sm:$0xff] }
  0x10   :  { %2203 = vmatmul.mubr.msk.f32.gmra.mrb[2].mxu0 %vm61_vm1, %v22_v13  ;;  %2265 = vmatmul.mubr.msk.f32.gmra.mrb[2].mxu1 %vm61_vm1, %v1815_v14  ;;  %v1831_v46 = vld [vmem:[%s3727_s0 + $0x1b8] sm:$0xff]  ;;  %v1832_v48 = vld [vmem:[%s3727_s0 + $0x1c0] sm:$0xff]  ;;  %v40_v49 = vld [vmem:[%s3727_s0 + $0xa8] sm:$0xff] }
  0x11   :  { %2205 = vmatprep.mubr.msk.f32.mxu0 %vm61_vm1, %v23_v15  ;;  %2267 = vmatprep.mubr.msk.f32.mxu1 %vm61_vm1, %v1816_v16  ;;  %v1833_v50 = vld [vmem:[%s3727_s0 + $0x1c8] sm:$0xff]  ;;  %v41_v51 = vld [vmem:[%s3727_s0 + $0xb0] sm:$0xff]  ;;  %v42_v53 = vld [vmem:[%s3727_s0 + $0xb8] sm:$0xff] }
  0x12   :  { %2468 = vmatpush3.bf16.msk.msra.mxu0 %vm2516_vm3, %v2443_v6  ;;  %2478 = vmatpush3.bf16.msk.msra.mxu1 %vm2516_vm3, %v2443_v6  ;;  %v1834_v52 = vld [vmem:[%s3727_s0 + $0x1d0] sm:$0xff]  ;;  %v1835_v54 = vld [vmem:[%s3727_s0 + $0x1d8] sm:$0xff]  ;;  %v43_v55 = vld [vmem:[%s3727_s0 + $0xc0] sm:$0xff] }
  0x13   :  { %v1836_v56 = vld [vmem:[%s3727_s0 + $0x1e0] sm:$0xff]  ;;  %v44_v57 = vld [vmem:[%s3727_s0 + $0xc8] sm:$0xff]  ;;  %v45_v59 = vld [vmem:[%s3727_s0 + $0xd0] sm:$0xff] }
  0x14   :  { %2206 = vmatmul.mubr.msk.f32.gmra.mrb[4].mxu0 %vm61_vm1, %v24_v17  ;;  %2268 = vmatmul.mubr.msk.f32.gmra.mrb[4].mxu1 %vm61_vm1, %v1817_v18  ;;  %v1837_v58 = vld [vmem:[%s3727_s0 + $0x1e8] sm:$0xff]  ;;  %v1838_v60 = vld [vmem:[%s3727_s0 + $0x1f0] sm:$0xff]  ;;  %v46_v61 = vld [vmem:[%s3727_s0 + $0xd8] sm:$0xff] }
  0x15   :  { %2208 = vmatprep.mubr.msk.f32.mxu0 %vm61_vm1, %v25_v19  ;;  %2270 = vmatprep.mubr.msk.f32.mxu1 %vm61_vm1, %v1818_v20  ;;  %v1839_v62 = vld [vmem:[%s3727_s0 + $0x1f8] sm:$0xff]  ;;  %v47_v63 = vld [vmem:[%s3727_s0 + $0xe0] sm:$0xff]  ;;  %v48_v1 = vld [vmem:[%s3727_s0 + $0xe8] sm:$0xff] }
  0x16   :  { %v1840_v0 = vld [vmem:[%s3727_s0 + $0x200] sm:$0xff]  ;;  %v1841_v2 = vld [vmem:[%s3727_s0 + $0x208] sm:$0xff]  ;;  %v49_v3 = vld [vmem:[%s3727_s0 + $0xf0] sm:$0xff] }
  0x17   :  { %v1842_v4 = vld [vmem:[%s3727_s0 + $0x210] sm:$0xff]  ;;  %v50_v5 = vld [vmem:[%s3727_s0 + $0xf8] sm:$0xff]  ;;  %v51_v7 = vld [vmem:[%s3727_s0 + $0x100] sm:$0xff] }
  0x18   :  { %2209 = vmatmul.mubr.msk.f32.gmra.mrb[6].mxu0 %vm61_vm1, %v26_v21  ;;  %2271 = vmatmul.mubr.msk.f32.gmra.mrb[6].mxu1 %vm61_vm1, %v1819_v22  ;;  %v1843_v6 = vld [vmem:[%s3727_s0 + $0x218] sm:$0xff]  ;;  %v1844_v8 = vld [vmem:[%s3727_s0 + $0x220] sm:$0xff]  ;;  %v52_v9 = vld [vmem:[%s3727_s0 + $0x108] sm:$0xff] }
  0x19   :  { %2211 = vmatprep.mubr.msk.f32.mxu0 %vm61_vm1, %v27_v23  ;;  %2273 = vmatprep.mubr.msk.f32.mxu1 %vm61_vm1, %v1820_v24  ;;  %v1845_v10 = vld [vmem:[%s3727_s0 + $0x228] sm:$0xff]  ;;  %v53_v11 = vld [vmem:[%s3727_s0 + $0x110] sm:$0xff]  ;;  %v54_v13 = vld [vmem:[%s3727_s0 + $0x118] sm:$0xff] }
  0x1a   :  { %v1846_v12 = vld [vmem:[%s3727_s0 + $0x230] sm:$0xff]  ;;  %v1847_v14 = vld [vmem:[%s3727_s0 + $0x238] sm:$0xff]  ;;  %v1885_v15 = vld [vmem:[%s3727_s0 + $0x240] sm:$0xff] }
  0x1b   :  { %v1958_v16 = vld [vmem:[%s3727_s0 + $0x360] sm:$0xff]  ;;  %v1886_v17 = vld [vmem:[%s3727_s0 + $0x248] sm:$0xff]  ;;  %v1887_v19 = vld [vmem:[%s3727_s0 + $0x250] sm:$0xff] }
  0x1c   :  { %2212 = vmatmul.mubr.msk.f32.gmra.mrb[8].mxu0 %vm61_vm1, %v28_v25  ;;  %2274 = vmatmul.mubr.msk.f32.gmra.mrb[8].mxu1 %vm61_vm1, %v1821_v26  ;;  %v1959_v18 = vld [vmem:[%s3727_s0 + $0x368] sm:$0xff]  ;;  %v1960_v20 = vld [vmem:[%s3727_s0 + $0x370] sm:$0xff]  ;;  %v1888_v21 = vld [vmem:[%s3727_s0 + $0x258] sm:$0xff] }
  0x1d   :  { %2214 = vmatprep.mubr.msk.f32.mxu0 %vm61_vm1, %v29_v27  ;;  %2276 = vmatprep.mubr.msk.f32.mxu1 %vm61_vm1, %v1822_v28  ;;  %v1961_v22 = vld [vmem:[%s3727_s0 + $0x378] sm:$0xff]  ;;  %v1889_v23 = vld [vmem:[%s3727_s0 + $0x260] sm:$0xff]  ;;  %v1890_v25 = vld [vmem:[%s3727_s0 + $0x268] sm:$0xff] }
  0x1e   :  { %v1962_v24 = vld [vmem:[%s3727_s0 + $0x380] sm:$0xff]  ;;  %v1963_v26 = vld [vmem:[%s3727_s0 + $0x388] sm:$0xff]  ;;  %v1891_v27 = vld [vmem:[%s3727_s0 + $0x270] sm:$0xff] }
  0x1f   :  { %v1964_v28 = vld [vmem:[%s3727_s0 + $0x390] sm:$0xff] }
  0x20   :  { %2215 = vmatmul.mubr.msk.f32.gmra.mrb[10].mxu0 %vm61_vm1, %v30_v29  ;;  %2277 = vmatmul.mubr.msk.f32.gmra.mrb[10].mxu1 %vm61_vm1, %v1823_v30  ;;  %v1892_v29 = vld [vmem:[%s3727_s0 + $0x278] sm:$0xff] }
  0x21   :  { %2217 = vmatprep.mubr.msk.f32.mxu0 %vm61_vm1, %v31_v31  ;;  %2279 = vmatprep.mubr.msk.f32.mxu1 %vm61_vm1, %v1824_v32  ;;  %v1965_v30 = vld [vmem:[%s3727_s0 + $0x398] sm:$0xff]  ;;  %v1893_v31 = vld [vmem:[%s3727_s0 + $0x280] sm:$0xff] }
  0x22   :  { %v1966_v32 = vld [vmem:[%s3727_s0 + $0x3a0] sm:$0xff] }
  0x24   :  { %2218 = vmatmul.mubr.msk.f32.gmra.mrb[12].mxu0 %vm61_vm1, %v32_v33  ;;  %2280 = vmatmul.mubr.msk.f32.gmra.mrb[12].mxu1 %vm61_vm1, %v1825_v34  ;;  %v1894_v33 = vld [vmem:[%s3727_s0 + $0x288] sm:$0xff] }
  0x25   :  { %2220 = vmatprep.mubr.msk.f32.mxu0 %vm61_vm1, %v33_v35  ;;  %2282 = vmatprep.mubr.msk.f32.mxu1 %vm61_vm1, %v1826_v36  ;;  %v1967_v34 = vld [vmem:[%s3727_s0 + $0x3a8] sm:$0xff]  ;;  %v1895_v35 = vld [vmem:[%s3727_s0 + $0x290] sm:$0xff] }
  0x26   :  { %v1968_v36 = vld [vmem:[%s3727_s0 + $0x3b0] sm:$0xff] }
  0x28   :  { %2221 = vmatmul.mubr.msk.f32.gmra.mrb[14].mxu0 %vm61_vm1, %v34_v37  ;;  %2283 = vmatmul.mubr.msk.f32.gmra.mrb[14].mxu1 %vm61_vm1, %v1827_v38  ;;  %v1896_v37 = vld [vmem:[%s3727_s0 + $0x298] sm:$0xff] }
  0x29   :  { %2223 = vmatprep.mubr.msk.f32.mxu0 %vm61_vm1, %v35_v39  ;;  %2285 = vmatprep.mubr.msk.f32.mxu1 %vm61_vm1, %v1828_v40  ;;  %v1969_v38 = vld [vmem:[%s3727_s0 + $0x3b8] sm:$0xff]  ;;  %v1897_v39 = vld [vmem:[%s3727_s0 + $0x2a0] sm:$0xff] }
  0x2a   :  { %v1970_v40 = vld [vmem:[%s3727_s0 + $0x3c0] sm:$0xff] }
  0x2c   :  { %2224 = vmatmul.mubr.msk.f32.gmra.mrb[16].mxu0 %vm61_vm1, %v36_v41  ;;  %2286 = vmatmul.mubr.msk.f32.gmra.mrb[16].mxu1 %vm61_vm1, %v1829_v42  ;;  %v1898_v41 = vld [vmem:[%s3727_s0 + $0x2a8] sm:$0xff] }
  0x2d   :  { %2226 = vmatprep.mubr.msk.f32.mxu0 %vm61_vm1, %v37_v43  ;;  %2288 = vmatprep.mubr.msk.f32.mxu1 %vm61_vm1, %v1830_v44  ;;  %v1971_v42 = vld [vmem:[%s3727_s0 + $0x3c8] sm:$0xff]  ;;  %v1899_v43 = vld [vmem:[%s3727_s0 + $0x2b0] sm:$0xff] }
  0x2e   :  { %v1972_v44 = vld [vmem:[%s3727_s0 + $0x3d0] sm:$0xff] }
  0x30   :  { %2227 = vmatmul.mubr.msk.f32.gmra.mrb[18].mxu0 %vm61_vm1, %v38_v45  ;;  %2289 = vmatmul.mubr.msk.f32.gmra.mrb[18].mxu1 %vm61_vm1, %v1831_v46  ;;  %v1900_v45 = vld [vmem:[%s3727_s0 + $0x2b8] sm:$0xff] }
  0x31   :  { %2229 = vmatprep.mubr.msk.f32.mxu0 %vm61_vm1, %v39_v47  ;;  %2291 = vmatprep.mubr.msk.f32.mxu1 %vm61_vm1, %v1832_v48  ;;  %v1973_v46 = vld [vmem:[%s3727_s0 + $0x3d8] sm:$0xff]  ;;  %v1901_v47 = vld [vmem:[%s3727_s0 + $0x2c0] sm:$0xff] }
  0x32   :  { %v1974_v48 = vld [vmem:[%s3727_s0 + $0x3e0] sm:$0xff] }
  0x34   :  { %2230 = vmatmul.mubr.msk.f32.gmra.mrb[20].mxu0 %vm61_vm1, %v40_v49  ;;  %2292 = vmatmul.mubr.msk.f32.gmra.mrb[20].mxu1 %vm61_vm1, %v1833_v50  ;;  %v1902_v49 = vld [vmem:[%s3727_s0 + $0x2c8] sm:$0xff] }
  0x35   :  { %2232 = vmatprep.mubr.msk.f32.mxu0 %vm61_vm1, %v41_v51  ;;  %2294 = vmatprep.mubr.msk.f32.mxu1 %vm61_vm1, %v1834_v52  ;;  %v1975_v50 = vld [vmem:[%s3727_s0 + $0x3e8] sm:$0xff]  ;;  %v1903_v51 = vld [vmem:[%s3727_s0 + $0x2d0] sm:$0xff] }
  0x36   :  { %v1976_v52 = vld [vmem:[%s3727_s0 + $0x3f0] sm:$0xff] }
  0x38   :  { %2233 = vmatmul.mubr.msk.f32.gmra.mrb[22].mxu0 %vm61_vm1, %v42_v53  ;;  %2295 = vmatmul.mubr.msk.f32.gmra.mrb[22].mxu1 %vm61_vm1, %v1835_v54  ;;  %v1904_v53 = vld [vmem:[%s3727_s0 + $0x2d8] sm:$0xff] }
  0x39   :  { %2235 = vmatprep.mubr.msk.f32.mxu0 %vm61_vm1, %v43_v55  ;;  %2297 = vmatprep.mubr.msk.f32.mxu1 %vm61_vm1, %v1836_v56  ;;  %v1977_v54 = vld [vmem:[%s3727_s0 + $0x3f8] sm:$0xff]  ;;  %v1905_v55 = vld [vmem:[%s3727_s0 + $0x2e0] sm:$0xff] }
  0x3a   :  { %v1978_v56 = vld [vmem:[%s3727_s0 + $0x400] sm:$0xff] }
  0x3c   :  { %2236 = vmatmul.mubr.msk.f32.gmra.mrb[24].mxu0 %vm61_vm1, %v44_v57  ;;  %2298 = vmatmul.mubr.msk.f32.gmra.mrb[24].mxu1 %vm61_vm1, %v1837_v58  ;;  %v1906_v57 = vld [vmem:[%s3727_s0 + $0x2e8] sm:$0xff] }
  0x3d   :  { %2238 = vmatprep.mubr.msk.f32.mxu0 %vm61_vm1, %v45_v59  ;;  %2300 = vmatprep.mubr.msk.f32.mxu1 %vm61_vm1, %v1838_v60  ;;  %v1979_v58 = vld [vmem:[%s3727_s0 + $0x408] sm:$0xff]  ;;  %v1907_v59 = vld [vmem:[%s3727_s0 + $0x2f0] sm:$0xff] }
  0x3e   :  { %v1980_v60 = vld [vmem:[%s3727_s0 + $0x410] sm:$0xff] }
  0x40   :  { %2239 = vmatmul.mubr.msk.f32.gmra.mrb[26].mxu0 %vm61_vm1, %v46_v61  ;;  %2301 = vmatmul.mubr.msk.f32.gmra.mrb[26].mxu1 %vm61_vm1, %v1839_v62  ;;  %v1908_v61 = vld [vmem:[%s3727_s0 + $0x2f8] sm:$0xff] }
  0x41   :  { %2241 = vmatprep.mubr.msk.f32.mxu0 %vm61_vm1, %v47_v63  ;;  %2303 = vmatprep.mubr.msk.f32.mxu1 %vm61_vm1, %v1840_v0  ;;  %v1981_v62 = vld [vmem:[%s3727_s0 + $0x418] sm:$0xff]  ;;  %v1909_v63 = vld [vmem:[%s3727_s0 + $0x300] sm:$0xff] }
  0x42   :  { %v1982_v0 = vld [vmem:[%s3727_s0 + $0x420] sm:$0xff] }
  0x44   :  { %2242 = vmatmul.mubr.msk.f32.gmra.mrb[28].mxu0 %vm61_vm1, %v48_v1  ;;  %2304 = vmatmul.mubr.msk.f32.gmra.mrb[28].mxu1 %vm61_vm1, %v1841_v2  ;;  %v1910_v1 = vld [vmem:[%s3727_s0 + $0x308] sm:$0xff] }
  0x45   :  { %2244 = vmatprep.mubr.msk.f32.mxu0 %vm61_vm1, %v49_v3  ;;  %2306 = vmatprep.mubr.msk.f32.mxu1 %vm61_vm1, %v1842_v4  ;;  %v1983_v2 = vld [vmem:[%s3727_s0 + $0x428] sm:$0xff]  ;;  %v1911_v3 = vld [vmem:[%s3727_s0 + $0x310] sm:$0xff] }
  0x46   :  { %v1984_v4 = vld [vmem:[%s3727_s0 + $0x430] sm:$0xff] }
  0x48   :  { %2245 = vmatmul.mubr.msk.f32.gmra.mrb[30].mxu0 %vm61_vm1, %v50_v5  ;;  %2307 = vmatmul.mubr.msk.f32.gmra.mrb[30].mxu1 %vm61_vm1, %v1843_v6  ;;  %v1912_v5 = vld [vmem:[%s3727_s0 + $0x318] sm:$0xff] }
  0x49   :  { %2247 = vmatprep.mubr.msk.f32.mxu0 %vm61_vm1, %v51_v7  ;;  %2309 = vmatprep.mubr.msk.f32.mxu1 %vm61_vm1, %v1844_v8  ;;  %v1985_v6 = vld [vmem:[%s3727_s0 + $0x438] sm:$0xff]  ;;  %v1913_v7 = vld [vmem:[%s3727_s0 + $0x320] sm:$0xff] }
  0x4a   :  { %v1986_v8 = vld [vmem:[%s3727_s0 + $0x440] sm:$0xff] }
  0x4c   :  { %2248 = vmatmul.mubr.msk.f32.gmra.mrb[32].mxu0 %vm61_vm1, %v52_v9  ;;  %2310 = vmatmul.mubr.msk.f32.gmra.mrb[32].mxu1 %vm61_vm1, %v1845_v10  ;;  %v1914_v9 = vld [vmem:[%s3727_s0 + $0x328] sm:$0xff] }
  0x4d   :  { %2250 = vmatprep.mubr.msk.f32.mxu0 %vm61_vm1, %v53_v11  ;;  %2312 = vmatprep.mubr.msk.f32.mxu1 %vm61_vm1, %v1846_v12  ;;  %v1987_v10 = vld [vmem:[%s3727_s0 + $0x448] sm:$0xff]  ;;  %v1915_v11 = vld [vmem:[%s3727_s0 + $0x330] sm:$0xff] }
  0x4e   :  { %v1988_v12 = vld [vmem:[%s3727_s0 + $0x450] sm:$0xff] }
  0x50   :  { %2251 = vmatmul.mubr.msk.f32.gmra.mrb[34].mxu0 %vm61_vm1, %v54_v13  ;;  %2313 = vmatmul.mubr.msk.f32.gmra.mrb[34].mxu1 %vm61_vm1, %v1847_v14  ;;  %v1916_v13 = vld [vmem:[%s3727_s0 + $0x338] sm:$0xff] }
  0x51   :  { %2323 = vmatprep.mubr.msk.f32.mxu0 %vm61_vm1, %v1885_v15  ;;  %2385 = vmatprep.mubr.msk.f32.mxu1 %vm61_vm1, %v1958_v16  ;;  %v1989_v14 = vld [vmem:[%s3727_s0 + $0x458] sm:$0xff]  ;;  %v1917_v15 = vld [vmem:[%s3727_s0 + $0x340] sm:$0xff] }
  0x52   :  { %v1990_v16 = vld [vmem:[%s3727_s0 + $0x460] sm:$0xff] }
  0x54   :  { %2324 = vmatmul.mubr.msk.f32.vlgmr.msra.gmra.mrb[36].mxu0 %vm61_vm1, %v1886_v17  ;;  %2386 = vmatmul.mubr.msk.f32.vlgmr.msra.gmra.mrb[36].mxu1 %vm61_vm1, %v1959_v18  ;;  %v1918_v17 = vld [vmem:[%s3727_s0 + $0x348] sm:$0xff] }
  0x55   :  { %2326 = vmatprep.mubr.msk.f32.mxu0 %vm61_vm1, %v1887_v19  ;;  %2388 = vmatprep.mubr.msk.f32.mxu1 %vm61_vm1, %v1960_v20  ;;  %v1991_v18 = vld [vmem:[%s3727_s0 + $0x468] sm:$0xff]  ;;  %v1919_v19 = vld [vmem:[%s3727_s0 + $0x350] sm:$0xff] }
  0x56   :  { %v1992_v20 = vld [vmem:[%s3727_s0 + $0x470] sm:$0xff] }
  0x58   :  { %2327 = vmatmul.mubr.msk.f32.gmra.mrb[38].mxu0 %vm61_vm1, %v1888_v21  ;;  %2389 = vmatmul.mubr.msk.f32.gmra.mrb[38].mxu1 %vm61_vm1, %v1961_v22  ;;  %v1920_v21 = vld [vmem:[%s3727_s0 + $0x358] sm:$0xff] }
  0x59   :  { %2329 = vmatprep.mubr.msk.f32.mxu0 %vm61_vm1, %v1889_v23  ;;  %2391 = vmatprep.mubr.msk.f32.mxu1 %vm61_vm1, %v1962_v24  ;;  %v1993_v22 = vld [vmem:[%s3727_s0 + $0x478] sm:$0xff]  ;;  %v3112_v23 = vld [vmem:[%s3728_s2] ss:$0 sm:$0xff] }
  0x5c   :  { %2330 = vmatmul.mubr.msk.f32.gmra.mrb[40].mxu0 %vm61_vm1, %v1890_v25  ;;  %2392 = vmatmul.mubr.msk.f32.gmra.mrb[40].mxu1 %vm61_vm1, %v1963_v26 }
  0x5d   :  { %2332 = vmatprep.mubr.msk.f32.mxu0 %vm61_vm1, %v1891_v27  ;;  %2394 = vmatprep.mubr.msk.f32.mxu1 %vm61_vm1, %v1964_v28 }
  0x60   :  { %2333 = vmatmul.mubr.msk.f32.gmra.mrb[42].mxu0 %vm61_vm1, %v1892_v29  ;;  %2395 = vmatmul.mubr.msk.f32.gmra.mrb[42].mxu1 %vm61_vm1, %v1965_v30 }
  0x61   :  { %2335 = vmatprep.mubr.msk.f32.mxu0 %vm61_vm1, %v1893_v31  ;;  %2397 = vmatprep.mubr.msk.f32.mxu1 %vm61_vm1, %v1966_v32 }
  0x64   :  { %2336 = vmatmul.mubr.msk.f32.gmra.mrb[44].mxu0 %vm61_vm1, %v1894_v33  ;;  %2398 = vmatmul.mubr.msk.f32.gmra.mrb[44].mxu1 %vm61_vm1, %v1967_v34 }
  0x65   :  { %2338 = vmatprep.mubr.msk.f32.mxu0 %vm61_vm1, %v1895_v35  ;;  %2400 = vmatprep.mubr.msk.f32.mxu1 %vm61_vm1, %v1968_v36 }
  0x68   :  { %2339 = vmatmul.mubr.msk.f32.gmra.mrb[46].mxu0 %vm61_vm1, %v1896_v37  ;;  %2401 = vmatmul.mubr.msk.f32.gmra.mrb[46].mxu1 %vm61_vm1, %v1969_v38 }
  0x69   :  { %2341 = vmatprep.mubr.msk.f32.mxu0 %vm61_vm1, %v1897_v39  ;;  %2403 = vmatprep.mubr.msk.f32.mxu1 %vm61_vm1, %v1970_v40 }
  0x6c   :  { %2342 = vmatmul.mubr.msk.f32.gmra.mrb[48].mxu0 %vm61_vm1, %v1898_v41  ;;  %2404 = vmatmul.mubr.msk.f32.gmra.mrb[48].mxu1 %vm61_vm1, %v1971_v42 }
  0x6d   :  { %2344 = vmatprep.mubr.msk.f32.mxu0 %vm61_vm1, %v1899_v43  ;;  %2406 = vmatprep.mubr.msk.f32.mxu1 %vm61_vm1, %v1972_v44 }
  0x70   :  { %2345 = vmatmul.mubr.msk.f32.gmra.mrb[50].mxu0 %vm61_vm1, %v1900_v45  ;;  %2407 = vmatmul.mubr.msk.f32.gmra.mrb[50].mxu1 %vm61_vm1, %v1973_v46 }
  0x71   :  { %2347 = vmatprep.mubr.msk.f32.mxu0 %vm61_vm1, %v1901_v47  ;;  %2409 = vmatprep.mubr.msk.f32.mxu1 %vm61_vm1, %v1974_v48 }
  0x74   :  { %2348 = vmatmul.mubr.msk.f32.gmra.mrb[52].mxu0 %vm61_vm1, %v1902_v49  ;;  %2410 = vmatmul.mubr.msk.f32.gmra.mrb[52].mxu1 %vm61_vm1, %v1975_v50 }
  0x75   :  { %2350 = vmatprep.mubr.msk.f32.mxu0 %vm61_vm1, %v1903_v51  ;;  %2412 = vmatprep.mubr.msk.f32.mxu1 %vm61_vm1, %v1976_v52 }
  0x78   :  { %2351 = vmatmul.mubr.msk.f32.gmra.mrb[54].mxu0 %vm61_vm1, %v1904_v53  ;;  %2413 = vmatmul.mubr.msk.f32.gmra.mrb[54].mxu1 %vm61_vm1, %v1977_v54 }
  0x79   :  { %2353 = vmatprep.mubr.msk.f32.mxu0 %vm61_vm1, %v1905_v55  ;;  %2415 = vmatprep.mubr.msk.f32.mxu1 %vm61_vm1, %v1978_v56 }
  0x7c   :  { %2354 = vmatmul.mubr.msk.f32.gmra.mrb[56].mxu0 %vm61_vm1, %v1906_v57  ;;  %2416 = vmatmul.mubr.msk.f32.gmra.mrb[56].mxu1 %vm61_vm1, %v1979_v58 }
  0x7d   :  { %2356 = vmatprep.mubr.msk.f32.mxu0 %vm61_vm1, %v1907_v59  ;;  %2418 = vmatprep.mubr.msk.f32.mxu1 %vm61_vm1, %v1980_v60 }
  0x80   :  { %2357 = vmatmul.mubr.msk.f32.gmra.mrb[58].mxu0 %vm61_vm1, %v1908_v61  ;;  %2419 = vmatmul.mubr.msk.f32.gmra.mrb[58].mxu1 %vm61_vm1, %v1981_v62 }
  0x81   :  { %2359 = vmatprep.mubr.msk.f32.mxu0 %vm61_vm1, %v1909_v63  ;;  %2421 = vmatprep.mubr.msk.f32.mxu1 %vm61_vm1, %v1982_v0 }
  0x84   :  { %2360 = vmatmul.mubr.msk.f32.gmra.mrb[60].mxu0 %vm61_vm1, %v1910_v1  ;;  %2422 = vmatmul.mubr.msk.f32.gmra.mrb[60].mxu1 %vm61_vm1, %v1983_v2 }
  0x85   :  { %2362 = vmatprep.mubr.msk.f32.mxu0 %vm61_vm1, %v1911_v3  ;;  %2424 = vmatprep.mubr.msk.f32.mxu1 %vm61_vm1, %v1984_v4 }
  0x88   :  { %2363 = vmatmul.mubr.msk.f32.gmra.mrb[62].mxu0 %vm61_vm1, %v1912_v5  ;;  %2425 = vmatmul.mubr.msk.f32.gmra.mrb[62].mxu1 %vm61_vm1, %v1985_v6 }
  0x89   :  { %2365 = vmatprep.mubr.msk.f32.mxu0 %vm61_vm1, %v1913_v7  ;;  %2427 = vmatprep.mubr.msk.f32.mxu1 %vm61_vm1, %v1986_v8 }
  0x8c   :  { %2366 = vmatmul.mubr.msk.f32.gmra.mrb[64].mxu0 %vm61_vm1, %v1914_v9  ;;  %2428 = vmatmul.mubr.msk.f32.gmra.mrb[64].mxu1 %vm61_vm1, %v1987_v10 }
  0x8d   :  { %2368 = vmatprep.mubr.msk.f32.mxu0 %vm61_vm1, %v1915_v11  ;;  %2430 = vmatprep.mubr.msk.f32.mxu1 %vm61_vm1, %v1988_v12 }
  0x90   :  { %2369 = vmatmul.mubr.msk.f32.gmra.mrb[66].mxu0 %vm61_vm1, %v1916_v13  ;;  %2431 = vmatmul.mubr.msk.f32.gmra.mrb[66].mxu1 %vm61_vm1, %v1989_v14 }
  0x91   :  { %2371 = vmatprep.mubr.msk.f32.mxu0 %vm61_vm1, %v1917_v15  ;;  %2433 = vmatprep.mubr.msk.f32.mxu1 %vm61_vm1, %v1990_v16 }
  0x94   :  { %2372 = vmatmul.mubr.msk.f32.gmra.mrb[68].mxu0 %vm61_vm1, %v1918_v17  ;;  %2434 = vmatmul.mubr.msk.f32.gmra.mrb[68].mxu1 %vm61_vm1, %v1991_v18 }
  0x95   :  { %2374 = vmatprep.mubr.msk.f32.mxu0 %vm61_vm1, %v1919_v19  ;;  %2436 = vmatprep.mubr.msk.f32.mxu1 %vm61_vm1, %v1992_v20 }
  0x98   :  { %2375 = vmatmul.mubr.msk.f32.gmra.mrb[70].mxu0 %vm61_vm1, %v1920_v21  ;;  %2437 = vmatmul.mubr.msk.f32.gmra.mrb[70].mxu1 %vm61_vm1, %v1993_v22 }
  0xdf   :  { %v2201_v24 = vpop.f32.mrb[0].mxu0  ;;  %v2263_v25 = vpop.f32.mrb[0].mxu1 }
  0xe0   :  { %v3115_v26 = vadd.f32 %v2201_v24, %v3112_v23  ;;  %v3118_v27 = vadd.f32 %v2263_v25, %v3112_v23  ;;  %v240_v28 = vpop.f32.mrb[1].mxu0  ;;  %v630_v29 = vpop.f32.mrb[1].mxu1 }
  0xe1   :  { %v3121_v30 = vadd.f32 %v3112_v23, %v240_v28  ;;  %v3124_v31 = vadd.f32 %v3112_v23, %v630_v29 }
  0xe3   :  { %v2204_v34 = vpop.f32.mrb[2].mxu0  ;;  %v2266_v35 = vpop.f32.mrb[2].mxu1 }
  0xe4   :  { %v3131_v36 = vadd.f32 %v2204_v34, %v3112_v23  ;;  %v3134_v37 = vadd.f32 %v2266_v35, %v3112_v23  ;;  %v250_v38 = vpop.f32.mrb[3].mxu0  ;;  %v640_v39 = vpop.f32.mrb[3].mxu1 }
  0xe5   :  { %v3137_v40 = vadd.f32 %v3112_v23, %v250_v38  ;;  %v3140_v41 = vadd.f32 %v3112_v23, %v640_v39 }
  0xe7   :  { %v2207_v44 = vpop.f32.mrb[4].mxu0  ;;  %v2269_v45 = vpop.f32.mrb[4].mxu1 }
  0xe8   :  { %v3147_v46 = vadd.f32 %v2207_v44, %v3112_v23  ;;  %v3150_v47 = vadd.f32 %v2269_v45, %v3112_v23  ;;  %v260_v48 = vpop.f32.mrb[5].mxu0  ;;  %v650_v49 = vpop.f32.mrb[5].mxu1 }
  0xe9   :  { %v3153_v50 = vadd.f32 %v3112_v23, %v260_v48  ;;  %v3156_v51 = vadd.f32 %v3112_v23, %v650_v49 }
  0xeb   :  { %v2210_v54 = vpop.f32.mrb[6].mxu0  ;;  %v2272_v55 = vpop.f32.mrb[6].mxu1 }
  0xec   :  { %v3163_v56 = vadd.f32 %v2210_v54, %v3112_v23  ;;  %v3166_v57 = vadd.f32 %v2272_v55, %v3112_v23  ;;  %v270_v58 = vpop.f32.mrb[7].mxu0  ;;  %v660_v59 = vpop.f32.mrb[7].mxu1 }
  0xed   :  { %v3169_v60 = vadd.f32 %v3112_v23, %v270_v58  ;;  %v3172_v61 = vadd.f32 %v3112_v23, %v660_v59 }
  0xef   :  { %v2213_v0 = vpop.f32.mrb[8].mxu0  ;;  %v2275_v1 = vpop.f32.mrb[8].mxu1 }
  0xf0   :  { %v3179_v2 = vadd.f32 %v2213_v0, %v3112_v23  ;;  %v3182_v3 = vadd.f32 %v2275_v1, %v3112_v23  ;;  %v280_v4 = vpop.f32.mrb[9].mxu0  ;;  %v670_v5 = vpop.f32.mrb[9].mxu1 }
  0xf1   :  { %v3185_v6 = vadd.f32 %v3112_v23, %v280_v4  ;;  %v3188_v7 = vadd.f32 %v3112_v23, %v670_v5 }
  0xf3   :  { %v2216_v10 = vpop.f32.mrb[10].mxu0  ;;  %v2278_v11 = vpop.f32.mrb[10].mxu1 }
  0xf4   :  { %v3195_v12 = vadd.f32 %v2216_v10, %v3112_v23  ;;  %v3198_v13 = vadd.f32 %v2278_v11, %v3112_v23  ;;  %v290_v14 = vpop.f32.mrb[11].mxu0  ;;  %v680_v15 = vpop.f32.mrb[11].mxu1 }
  0xf5   :  { %v3201_v16 = vadd.f32 %v3112_v23, %v290_v14  ;;  %v3204_v17 = vadd.f32 %v3112_v23, %v680_v15 }
  0xf7   :  { %v2219_v20 = vpop.f32.mrb[12].mxu0  ;;  %v2281_v21 = vpop.f32.mrb[12].mxu1 }
  0xf8   :  { %v3211_v22 = vadd.f32 %v2219_v20, %v3112_v23  ;;  %v3214_v24 = vadd.f32 %v2281_v21, %v3112_v23  ;;  %v300_v25 = vpop.f32.mrb[13].mxu0  ;;  %v690_v28 = vpop.f32.mrb[13].mxu1 }
  0xf9   :  { %v3217_v29 = vadd.f32 %v3112_v23, %v300_v25  ;;  %v3220_v34 = vadd.f32 %v3112_v23, %v690_v28 }
  0xfb   :  { %v2222_v39 = vpop.f32.mrb[14].mxu0  ;;  %v2284_v44 = vpop.f32.mrb[14].mxu1 }
  0xfc   :  { %v3227_v45 = vadd.f32 %v2222_v39, %v3112_v23  ;;  %v3230_v48 = vadd.f32 %v2284_v44, %v3112_v23  ;;  %v310_v49 = vpop.f32.mrb[15].mxu0  ;;  %v700_v54 = vpop.f32.mrb[15].mxu1 }
  0xfd   :  { %v3233_v55 = vadd.f32 %v3112_v23, %v310_v49  ;;  %v3236_v58 = vadd.f32 %v3112_v23, %v700_v54 }
  0xff   :  { %v2225_v1 = vpop.f32.mrb[16].mxu0  ;;  %v2287_v4 = vpop.f32.mrb[16].mxu1 }
 0x100   :  { %v3243_v5 = vadd.f32 %v2225_v1, %v3112_v23  ;;  %v3246_v10 = vadd.f32 %v2287_v4, %v3112_v23  ;;  %v320_v11 = vpop.f32.mrb[17].mxu0  ;;  %v710_v14 = vpop.f32.mrb[17].mxu1 }
 0x101   :  { %v3249_v15 = vadd.f32 %v3112_v23, %v320_v11  ;;  %v3252_v20 = vadd.f32 %v3112_v23, %v710_v14  ;;  %v3785_v14 = vmax.f32 %v3121_v30, %v3124_v31  ;;  %v3786_v30 = vmax.f32 %v3131_v36, %v3134_v37 }
 0x103   :  { %v2228_v28 = vpop.f32.mrb[18].mxu0  ;;  %v2290_v39 = vpop.f32.mrb[18].mxu1 }
 0x104   :  { %v3259_v44 = vadd.f32 %v2228_v28, %v3112_v23  ;;  %v3262_v49 = vadd.f32 %v2290_v39, %v3112_v23  ;;  %v330_v54 = vpop.f32.mrb[19].mxu0  ;;  %v720_v1 = vpop.f32.mrb[19].mxu1 }
 0x105   :  { %v3265_v4 = vadd.f32 %v3112_v23, %v330_v54  ;;  %v3268_v11 = vadd.f32 %v3112_v23, %v720_v1 }
 0x107   :  { %v2231_v21 = vpop.f32.mrb[20].mxu0  ;;  %v2293_v28 = vpop.f32.mrb[20].mxu1 }
 0x108   :  { %v3275_v0 = vadd.f32 %v2231_v21, %v3112_v23  ;;  %v3278_v39 = vadd.f32 %v2293_v28, %v3112_v23  ;;  %v340_v59 = vpop.f32.mrb[21].mxu0  ;;  %v730_v54 = vpop.f32.mrb[21].mxu1 }
 0x109   :  { %v3281_v38 = vadd.f32 %v3112_v23, %v340_v59  ;;  %v3284_v1 = vadd.f32 %v3112_v23, %v730_v54 }
 0x10b   :  { %v2234_v35 = vpop.f32.mrb[22].mxu0  ;;  %v2296_v21 = vpop.f32.mrb[22].mxu1 }
 0x10c   :  { %v3291_v19 = vadd.f32 %v2234_v35, %v3112_v23  ;;  %v3294_v28 = vadd.f32 %v2296_v21, %v3112_v23  ;;  %v350_v18 = vpop.f32.mrb[23].mxu0  ;;  %v740_v59 = vpop.f32.mrb[23].mxu1 }
 0x10d   :  { %v3297_v9 = vadd.f32 %v3112_v23, %v350_v18  ;;  %v3300_v54 = vadd.f32 %v3112_v23, %v740_v59 }
 0x10f   :  { %3758 = vst [vmem:[#allocation2_spill] sm:$0xff] %v3297_v9  ;;  %3759 = vst [vmem:[#allocation3_spill] sm:$0xff] %v3300_v54  ;;  %v2237_v8 = vpop.f32.mrb[24].mxu0  ;;  %v2299_v35 = vpop.f32.mrb[24].mxu1 }
 0x110   :  { %v3307_v63 = vadd.f32 %v2237_v8, %v3112_v23  ;;  %v3310_v21 = vadd.f32 %v2299_v35, %v3112_v23  ;;  %v360_v62 = vpop.f32.mrb[25].mxu0  ;;  %v750_v18 = vpop.f32.mrb[25].mxu1 }
 0x111   :  { %v3313_v53 = vadd.f32 %v3112_v23, %v360_v62  ;;  %v3316_v59 = vadd.f32 %v3112_v23, %v750_v18 }
 0x112   :  { %3760 = vst [vmem:[#allocation4_spill] sm:$0xff] %v3307_v63  ;;  %3761 = vst [vmem:[#allocation5_spill] sm:$0xff] %v3310_v21 }
 0x113   :  { %3762 = vst [vmem:[#allocation6_spill] sm:$0xff] %v3313_v53  ;;  %3763 = vst [vmem:[#allocation7_spill] sm:$0xff] %v3316_v59  ;;  %v2240_v52 = vpop.f32.mrb[26].mxu0  ;;  %v2302_v8 = vpop.f32.mrb[26].mxu1 }
 0x114   :  { %v3323_v43 = vadd.f32 %v2240_v52, %v3112_v23  ;;  %v3326_v35 = vadd.f32 %v2302_v8, %v3112_v23  ;;  %v370_v42 = vpop.f32.mrb[27].mxu0  ;;  %v760_v62 = vpop.f32.mrb[27].mxu1 }
 0x115   :  { %v3329_v33 = vadd.f32 %v3112_v23, %v370_v42  ;;  %v3332_v18 = vadd.f32 %v3112_v23, %v760_v62 }
 0x116   :  { %3764 = vst [vmem:[#allocation8_spill] sm:$0xff] %v3323_v43  ;;  %3765 = vst [vmem:[#allocation9_spill] sm:$0xff] %v3326_v35 }
 0x117   :  { %3766 = vst [vmem:[#allocation10_spill] sm:$0xff] %v3329_v33  ;;  %3767 = vst [vmem:[#allocation11_spill] sm:$0xff] %v3332_v18  ;;  %v2243_v32 = vpop.f32.mrb[28].mxu0  ;;  %v2305_v52 = vpop.f32.mrb[28].mxu1 }
 0x118   :  { %v3339_v59 = vadd.f32 %v2243_v32, %v3112_v23  ;;  %v3342_v8 = vadd.f32 %v2305_v52, %v3112_v23  ;;  %v380_v53 = vpop.f32.mrb[29].mxu0  ;;  %v770_v42 = vpop.f32.mrb[29].mxu1 }
 0x119   :  { %v3345_v21 = vadd.f32 %v3112_v23, %v380_v53  ;;  %v3348_v62 = vadd.f32 %v3112_v23, %v770_v42 }
 0x11a   :  { %3768 = vst [vmem:[#allocation12_spill] sm:$0xff] %v3339_v59  ;;  %3769 = vst [vmem:[#allocation13_spill] sm:$0xff] %v3342_v8 }
 0x11b   :  { %3770 = vst [vmem:[#allocation14_spill] sm:$0xff] %v3345_v21  ;;  %3771 = vst [vmem:[#allocation15_spill] sm:$0xff] %v3348_v62  ;;  %v2246_v18 = vpop.f32.mrb[30].mxu0  ;;  %v2308_v32 = vpop.f32.mrb[30].mxu1 }
 0x11c   :  { %v3355_v33 = vadd.f32 %v2246_v18, %v3112_v23  ;;  %v3358_v52 = vadd.f32 %v2308_v32, %v3112_v23  ;;  %v390_v35 = vpop.f32.mrb[31].mxu0  ;;  %v780_v53 = vpop.f32.mrb[31].mxu1 }
 0x11d   :  { %v3361_v43 = vadd.f32 %v3112_v23, %v390_v35  ;;  %v3364_v42 = vadd.f32 %v3112_v23, %v780_v53 }
 0x11e   :  { %3772 = vst [vmem:[#allocation16_spill] sm:$0xff] %v3355_v33  ;;  %3773 = vst [vmem:[#allocation17_spill] sm:$0xff] %v3358_v52 }
 0x11f   :  { %3774 = vst [vmem:[#allocation18_spill] sm:$0xff] %v3361_v43  ;;  %3775 = vst [vmem:[#allocation19_spill] sm:$0xff] %v3364_v42  ;;  %v2249_v62 = vpop.f32.mrb[32].mxu0  ;;  %v2311_v18 = vpop.f32.mrb[32].mxu1 }
 0x120   :  { %v3371_v21 = vadd.f32 %v2249_v62, %v3112_v23  ;;  %v3374_v32 = vadd.f32 %v2311_v18, %v3112_v23  ;;  %v400_v8 = vpop.f32.mrb[33].mxu0  ;;  %v790_v35 = vpop.f32.mrb[33].mxu1 }
 0x121   :  { %v3377_v59 = vadd.f32 %v3112_v23, %v400_v8  ;;  %v3380_v53 = vadd.f32 %v3112_v23, %v790_v35 }
 0x122   :  { %3776 = vst [vmem:[#allocation20_spill] sm:$0xff] %v3371_v21  ;;  %3777 = vst [vmem:[#allocation21_spill] sm:$0xff] %v3374_v32 }
 0x123   :  { %3778 = vst [vmem:[#allocation22_spill] sm:$0xff] %v3377_v59  ;;  %3779 = vst [vmem:[#allocation23_spill] sm:$0xff] %v3380_v53  ;;  %v2252_v42 = vpop.f32.mrb[34].mxu0  ;;  %v2314_v62 = vpop.f32.mrb[34].mxu1 }
 0x124   :  { %v3387_v43 = vadd.f32 %v2252_v42, %v3112_v23  ;;  %v3390_v18 = vadd.f32 %v2314_v62, %v3112_v23  ;;  %v410_v52 = vpop.f32.mrb[35].mxu0  ;;  %v800_v8 = vpop.f32.mrb[35].mxu1 }
 0x125   :  { %v3393_v33 = vadd.f32 %v3112_v23, %v410_v52  ;;  %v3396_v35 = vadd.f32 %v3112_v23, %v800_v8  ;;  %v3784_v8 = vmax.f32 %v3115_v26, %v3118_v27 }
 0x126   :  { %3780 = vst [vmem:[#allocation24_spill] sm:$0xff] %v3387_v43  ;;  %3781 = vst [vmem:[#allocation25_spill] sm:$0xff] %v3390_v18 }
 0x127   :  { %3782 = vst [vmem:[#allocation26_spill] sm:$0xff] %v3393_v33  ;;  %3783 = vst [vmem:[#allocation27_spill] sm:$0xff] %v3396_v35  ;;  %v2325_v53 = vpop.f32.mrb[36].mxu0  ;;  %v2387_v42 = vpop.f32.mrb[36].mxu1 }
 0x128   :  { %v1062_v59 = vadd.f32 %v2325_v53, %v3112_v23  ;;  %v1056_v62 = vpop.f32.mrb[37].mxu0  ;;  %v1488_v32 = vadd.f32 %v2387_v42, %v3112_v23  ;;  %v1482_v21 = vpop.f32.mrb[37].mxu1 }
 0x129   :  { %v1057_v52 = vadd.f32 %v3112_v23, %v1056_v62  ;;  %v1483_v63 = vadd.f32 %v3112_v23, %v1482_v21 }
 0x12a   :  { %v1236_v54 = vmax.f32 %v3784_v8, %v1062_v59 }
 0x12b   :  { %v1235_v25 = vmax.f32 %v3785_v14, %v1057_v52  ;;  %v2328_v35 = vpop.f32.mrb[38].mxu0  ;;  %v2390_v33 = vpop.f32.mrb[38].mxu1 }
 0x12c   :  { %v1662_v18 = vmax.f32 %v1236_v54, %v1488_v32  ;;  %v1072_v53 = vadd.f32 %v2328_v35, %v3112_v23  ;;  %v1066_v43 = vpop.f32.mrb[39].mxu0  ;;  %v1498_v42 = vadd.f32 %v2390_v33, %v3112_v23  ;;  %v1492_v9 = vpop.f32.mrb[39].mxu1  ;;  %v3787_v54 = vmax.f32 %v3137_v40, %v3140_v41 }
 0x12d   :  { %v1661_v62 = vmax.f32 %v1235_v25, %v1483_v63  ;;  %v1067_v21 = vadd.f32 %v3112_v23, %v1066_v43  ;;  %v1493_v26 = vadd.f32 %v3112_v23, %v1492_v9 }
 0x12e   :  { %v1698_v27 = vmax.f32 %v1662_v18, 0.0  ;;  %v1238_v31 = vmax.f32 %v3786_v30, %v1072_v53  ;;  %v3788_v18 = vmax.f32 %v3147_v46, %v3150_v47  ;;  %v3789_v53 = vmax.f32 %v3153_v50, %v3156_v51 }
 0x12f   :  { %v1697_v14 = vmax.f32 %v1661_v62, 0.0  ;;  %v1237_v59 = vmax.f32 %v3787_v54, %v1067_v21  ;;  %v2331_v32 = vpop.f32.mrb[40].mxu0  ;;  %v2393_v35 = vpop.f32.mrb[40].mxu1  ;;  %v3790_v54 = vmax.f32 %v3163_v56, %v3166_v57 }
 0x130   :  { %1735 = vst.msk [vmem:[%s3729_s3 + $0x8] sm:$0xff] %vm1733_vm4, %v1698_v27  ;;  %v1664_v33 = vmax.f32 %v1238_v31, %v1498_v42  ;;  %v1082_v43 = vadd.f32 %v2331_v32, %v3112_v23  ;;  %v1076_v63 = vpop.f32.mrb[41].mxu0  ;;  %v1508_v9 = vadd.f32 %v2393_v35, %v3112_v23  ;;  %v1502_v36 = vpop.f32.mrb[41].mxu1  ;;  %v3791_v35 = vmax.f32 %v3169_v60, %v3172_v61 }
 0x131   :  { %1734 = vst.msk [vmem:[%s3729_s3] sm:$0xff] %vm1733_vm4, %v1697_v14  ;;  %v1663_v37 = vmax.f32 %v1237_v59, %v1493_v26  ;;  %v1077_v40 = vadd.f32 %v3112_v23, %v1076_v63  ;;  %v1503_v41 = vadd.f32 %v3112_v23, %v1502_v36 }
 0x132   :  { %v1700_v25 = vmax.f32 %v1664_v33, 0.0  ;;  %v1240_v52 = vmax.f32 %v3788_v18, %v1082_v43 }
 0x133   :  { %v1699_v8 = vmax.f32 %v1663_v37, 0.0  ;;  %v1239_v42 = vmax.f32 %v3789_v53, %v1077_v40  ;;  %v2334_v62 = vpop.f32.mrb[42].mxu0  ;;  %v2396_v21 = vpop.f32.mrb[42].mxu1 }
 0x134   :  { %1737 = vst.msk [vmem:[%s3729_s3 + $0x18] sm:$0xff] %vm1733_vm4, %v1700_v25  ;;  %v1666_v26 = vmax.f32 %v1240_v52, %v1508_v9  ;;  %v1092_v27 = vadd.f32 %v2334_v62, %v3112_v23  ;;  %v1086_v30 = vpop.f32.mrb[43].mxu0  ;;  %v1518_v31 = vadd.f32 %v2396_v21, %v3112_v23  ;;  %v1512_v46 = vpop.f32.mrb[43].mxu1  ;;  %v3792_v25 = vmax.f32 %v3179_v2, %v3182_v3 }
 0x135   :  { %1736 = vst.msk [vmem:[%s3729_s3 + $0x10] sm:$0xff] %vm1733_vm4, %v1699_v8  ;;  %v1665_v47 = vmax.f32 %v1239_v42, %v1503_v41  ;;  %v1087_v50 = vadd.f32 %v3112_v23, %v1086_v30  ;;  %v1513_v51 = vadd.f32 %v3112_v23, %v1512_v46  ;;  %v3793_v8 = vmax.f32 %v3185_v6, %v3188_v7 }
 0x136   :  { %v1702_v14 = vmax.f32 %v1666_v26, 0.0  ;;  %v1242_v59 = vmax.f32 %v3790_v54, %v1092_v27  ;;  %v3794_v46 = vmax.f32 %v3195_v12, %v3198_v13 }
 0x137   :  { %v1701_v32 = vmax.f32 %v1665_v47, 0.0  ;;  %v1241_v33 = vmax.f32 %v3791_v35, %v1087_v50  ;;  %v2337_v43 = vpop.f32.mrb[44].mxu0  ;;  %v2399_v63 = vpop.f32.mrb[44].mxu1 }
 0x138   :  { %1739 = vst.msk [vmem:[%s3729_s3 + $0x28] sm:$0xff] %vm1733_vm4, %v1702_v14  ;;  %v1668_v9 = vmax.f32 %v1242_v59, %v1518_v31  ;;  %v1102_v36 = vadd.f32 %v2337_v43, %v3112_v23  ;;  %v1096_v37 = vpop.f32.mrb[45].mxu0  ;;  %v1528_v40 = vadd.f32 %v2399_v63, %v3112_v23  ;;  %v1522_v56 = vpop.f32.mrb[45].mxu1 }
 0x139   :  { %1738 = vst.msk [vmem:[%s3729_s3 + $0x20] sm:$0xff] %vm1733_vm4, %v1701_v32  ;;  %v1667_v57 = vmax.f32 %v1241_v33, %v1513_v51  ;;  %v1097_v60 = vadd.f32 %v3112_v23, %v1096_v37  ;;  %v1523_v61 = vadd.f32 %v3112_v23, %v1522_v56  ;;  %v3795_v51 = vmax.f32 %v3201_v16, %v3204_v17 }
 0x13a   :  { %v1704_v41 = vmax.f32 %v1668_v9, 0.0  ;;  %v1244_v18 = vmax.f32 %v3792_v25, %v1102_v36  ;;  %v3796_v9 = vmax.f32 %v3211_v22, %v3214_v24 }
 0x13b   :  { %v1703_v52 = vmax.f32 %v1667_v57, 0.0  ;;  %v1243_v53 = vmax.f32 %v3793_v8, %v1097_v60  ;;  %v2340_v42 = vpop.f32.mrb[46].mxu0  ;;  %v2402_v62 = vpop.f32.mrb[46].mxu1  ;;  %v3798_v8 = vmax.f32 %v3227_v45, %v3230_v48 }
 0x13c   :  { %1741 = vst.msk [vmem:[%s3729_s3 + $0x38] sm:$0xff] %vm1733_vm4, %v1704_v41  ;;  %v1670_v21 = vmax.f32 %v1244_v18, %v1528_v40  ;;  %v1112_v26 = vadd.f32 %v2340_v42, %v3112_v23  ;;  %v1106_v27 = vpop.f32.mrb[47].mxu0  ;;  %v1538_v30 = vadd.f32 %v2402_v62, %v3112_v23  ;;  %v1532_v2 = vpop.f32.mrb[47].mxu1  ;;  %v3797_v40 = vmax.f32 %v3217_v29, %v3220_v34 }
 0x13d   :  { %1740 = vst.msk [vmem:[%s3729_s3 + $0x30] sm:$0xff] %vm1733_vm4, %v1703_v52  ;;  %v1669_v3 = vmax.f32 %v1243_v53, %v1523_v61  ;;  %v1107_v6 = vadd.f32 %v3112_v23, %v1106_v27  ;;  %v1533_v7 = vadd.f32 %v3112_v23, %v1532_v2  ;;  %v3799_v62 = vmax.f32 %v3233_v55, %v3236_v58 }
 0x13e   :  { %v1706_v31 = vmax.f32 %v1670_v21, 0.0  ;;  %v1246_v47 = vmax.f32 %v3794_v46, %v1112_v26 }
 0x13f   :  { %v1705_v50 = vmax.f32 %v1669_v3, 0.0  ;;  %v1245_v14 = vmax.f32 %v3795_v51, %v1107_v6  ;;  %v2343_v54 = vpop.f32.mrb[48].mxu0  ;;  %v2405_v59 = vpop.f32.mrb[48].mxu1 }
 0x140   :  { %1743 = vst.msk [vmem:[%s3729_s3 + $0x48] sm:$0xff] %vm1733_vm4, %v1706_v31  ;;  %v1672_v32 = vmax.f32 %v1246_v47, %v1538_v30  ;;  %v1122_v35 = vadd.f32 %v2343_v54, %v3112_v23  ;;  %v1116_v33 = vpop.f32.mrb[49].mxu0  ;;  %v1548_v43 = vadd.f32 %v2405_v59, %v3112_v23  ;;  %v1542_v12 = vpop.f32.mrb[49].mxu1  ;;  %v3800_v31 = vmax.f32 %v3243_v5, %v3246_v10 }
 0x141   :  { %1742 = vst.msk [vmem:[%s3729_s3 + $0x40] sm:$0xff] %vm1733_vm4, %v1705_v50  ;;  %v1671_v13 = vmax.f32 %v1245_v14, %v1533_v7  ;;  %v1117_v16 = vadd.f32 %v3112_v23, %v1116_v33  ;;  %v1543_v17 = vadd.f32 %v3112_v23, %v1542_v12  ;;  %v3801_v50 = vmax.f32 %v3249_v15, %v3252_v20 }
 0x142   :  { %v1708_v63 = vmax.f32 %v1672_v32, 0.0  ;;  %v1248_v36 = vmax.f32 %v3796_v9, %v1122_v35  ;;  %v3802_v12 = vmax.f32 %v3259_v44, %v3262_v49 }
 0x143   :  { %v1707_v37 = vmax.f32 %v1671_v13, 0.0  ;;  %v1247_v56 = vmax.f32 %v3797_v40, %v1117_v16  ;;  %v2346_v57 = vpop.f32.mrb[50].mxu0  ;;  %v2408_v60 = vpop.f32.mrb[50].mxu1 }
 0x144   :  { %1745 = vst.msk [vmem:[%s3729_s3 + $0x58] sm:$0xff] %vm1733_vm4, %v1708_v63  ;;  %v1674_v61 = vmax.f32 %v1248_v36, %v1548_v43  ;;  %v1132_v41 = vadd.f32 %v2346_v57, %v3112_v23  ;;  %v1126_v25 = vpop.f32.mrb[51].mxu0  ;;  %v1558_v18 = vadd.f32 %v2408_v60, %v3112_v23  ;;  %v1552_v22 = vpop.f32.mrb[51].mxu1 }
 0x145   :  { %1744 = vst.msk [vmem:[%s3729_s3 + $0x50] sm:$0xff] %vm1733_vm4, %v1707_v37  ;;  %v1673_v24 = vmax.f32 %v1247_v56, %v1543_v17  ;;  %v1127_v29 = vadd.f32 %v3112_v23, %v1126_v25  ;;  %v1553_v34 = vadd.f32 %v3112_v23, %v1552_v22  ;;  %v3803_v17 = vmax.f32 %v3265_v4, %v3268_v11 }
 0x146   :  { %v1710_v52 = vmax.f32 %v1674_v61, 0.0  ;;  %v1250_v53 = vmax.f32 %v3798_v8, %v1132_v41  ;;  %v3804_v61 = vmax.f32 %v3275_v0, %v3278_v39 }
 0x147   :  { %v1709_v42 = vmax.f32 %v1673_v24, 0.0  ;;  %v1249_v21 = vmax.f32 %v3799_v62, %v1127_v29  ;;  %v2349_v26 = vpop.f32.mrb[52].mxu0  ;;  %v2411_v27 = vpop.f32.mrb[52].mxu1  ;;  %v3806_v62 = vmax.f32 %v3291_v19, %v3294_v28 }
 0x148   :  { %1747 = vst.msk [vmem:[%s3729_s3 + $0x68] sm:$0xff] %vm1733_vm4, %v1710_v52  ;;  %v1676_v30 = vmax.f32 %v1250_v53, %v1558_v18  ;;  %v1142_v2 = vadd.f32 %v2349_v26, %v3112_v23  ;;  %v1136_v3 = vpop.f32.mrb[53].mxu0  ;;  %v1568_v6 = vadd.f32 %v2411_v27, %v3112_v23  ;;  %v1562_v45 = vpop.f32.mrb[53].mxu1  ;;  %v3805_v18 = vmax.f32 %v3281_v38, %v3284_v1  ;;  %v3807_v27 = vld [vmem:[#allocation2_spill] sm:$0xff] }
 0x149   :  { %1746 = vst.msk [vmem:[%s3729_s3 + $0x60] sm:$0xff] %vm1733_vm4, %v1709_v42  ;;  %v1675_v48 = vmax.f32 %v1249_v21, %v1553_v34  ;;  %v1137_v55 = vadd.f32 %v3112_v23, %v1136_v3  ;;  %v1563_v58 = vadd.f32 %v3112_v23, %v1562_v45 }
 0x14a   :  { %v1712_v7 = vmax.f32 %v1676_v30, 0.0  ;;  %v1252_v46 = vmax.f32 %v3800_v31, %v1142_v2  ;;  %v3808_v30 = vld [vmem:[#allocation3_spill] sm:$0xff] }
 0x14b   :  { %v1711_v47 = vmax.f32 %v1675_v48, 0.0  ;;  %v1251_v51 = vmax.f32 %v3801_v50, %v1137_v55  ;;  %v2352_v14 = vpop.f32.mrb[54].mxu0  ;;  %v2414_v54 = vpop.f32.mrb[54].mxu1  ;;  %v3809_v2 = vmax.f32 %v3807_v27, %v3808_v30  ;;  %v3810_v50 = vld [vmem:[#allocation4_spill] sm:$0xff] }
 0x14c   :  { %1749 = vst.msk [vmem:[%s3729_s3 + $0x78] sm:$0xff] %vm1733_vm4, %v1712_v7  ;;  %v1678_v59 = vmax.f32 %v1252_v46, %v1568_v6  ;;  %v1152_v32 = vadd.f32 %v2352_v14, %v3112_v23  ;;  %v1146_v35 = vpop.f32.mrb[55].mxu0  ;;  %v1578_v33 = vadd.f32 %v2414_v54, %v3112_v23  ;;  %v1572_v5 = vpop.f32.mrb[55].mxu1 }
 0x14d   :  { %1748 = vst.msk [vmem:[%s3729_s3 + $0x70] sm:$0xff] %vm1733_vm4, %v1711_v47  ;;  %v1677_v10 = vmax.f32 %v1251_v51, %v1563_v58  ;;  %v1147_v15 = vadd.f32 %v3112_v23, %v1146_v35  ;;  %v1573_v20 = vadd.f32 %v3112_v23, %v1572_v5  ;;  %v3811_v51 = vld [vmem:[#allocation5_spill] sm:$0xff]  ;;  %v3814_v35 = vld [vmem:[#allocation7_spill] sm:$0xff] }
 0x14e   :  { %v1714_v43 = vmax.f32 %v1678_v59, 0.0  ;;  %v1254_v13 = vmax.f32 %v3802_v12, %v1152_v32  ;;  %v3812_v14 = vmax.f32 %v3810_v50, %v3811_v51  ;;  %v3813_v32 = vld [vmem:[#allocation6_spill] sm:$0xff] }
 0x14f   :  { %v1713_v16 = vmax.f32 %v1677_v10, 0.0  ;;  %v1253_v63 = vmax.f32 %v3803_v17, %v1147_v15  ;;  %v2355_v9 = vpop.f32.mrb[56].mxu0  ;;  %v2417_v36 = vpop.f32.mrb[56].mxu1 }
 0x150   :  { %1751 = vst.msk [vmem:[%s3729_s3 + $0x88] sm:$0xff] %vm1733_vm4, %v1714_v43  ;;  %v1680_v37 = vmax.f32 %v1254_v13, %v1578_v33  ;;  %v1162_v40 = vadd.f32 %v2355_v9, %v3112_v23  ;;  %v1156_v56 = vpop.f32.mrb[57].mxu0  ;;  %v1588_v57 = vadd.f32 %v2417_v36, %v3112_v23  ;;  %v1582_v44 = vpop.f32.mrb[57].mxu1  ;;  %v3815_v33 = vmax.f32 %v3813_v32, %v3814_v35 }
 0x151   :  { %1750 = vst.msk [vmem:[%s3729_s3 + $0x80] sm:$0xff] %vm1733_vm4, %v1713_v16  ;;  %v1679_v49 = vmax.f32 %v1253_v63, %v1573_v20  ;;  %v1157_v4 = vadd.f32 %v3112_v23, %v1156_v56  ;;  %v1583_v11 = vadd.f32 %v3112_v23, %v1582_v44 }
 0x152   :  { %v1716_v60 = vmax.f32 %v1680_v37, 0.0  ;;  %v1256_v41 = vmax.f32 %v3804_v61, %v1162_v40  ;;  %v3816_v37 = vld [vmem:[#allocation8_spill] sm:$0xff]  ;;  %v3817_v40 = vld [vmem:[#allocation9_spill] sm:$0xff] }
 0x153   :  { %v1715_v25 = vmax.f32 %v1679_v49, 0.0  ;;  %v1255_v22 = vmax.f32 %v3805_v18, %v1157_v4  ;;  %v2358_v24 = vpop.f32.mrb[58].mxu0  ;;  %v2420_v29 = vpop.f32.mrb[58].mxu1  ;;  %v3818_v56 = vmax.f32 %v3816_v37, %v3817_v40  ;;  %v3819_v49 = vld [vmem:[#allocation10_spill] sm:$0xff]  ;;  %v3820_v4 = vld [vmem:[#allocation11_spill] sm:$0xff] }
 0x154   :  { %1753 = vst.msk [vmem:[%s3729_s3 + $0x98] sm:$0xff] %vm1733_vm4, %v1716_v60  ;;  %v1682_v34 = vmax.f32 %v1256_v41, %v1588_v57  ;;  %v1172_v52 = vadd.f32 %v2358_v24, %v3112_v23  ;;  %v1166_v8 = vpop.f32.mrb[59].mxu0  ;;  %v1598_v53 = vadd.f32 %v2420_v29, %v3112_v23  ;;  %v1592_v0 = vpop.f32.mrb[59].mxu1 }
 0x155   :  { %1752 = vst.msk [vmem:[%s3729_s3 + $0x90] sm:$0xff] %vm1733_vm4, %v1715_v25  ;;  %v1681_v38 = vmax.f32 %v1255_v22, %v1583_v11  ;;  %v1167_v39 = vadd.f32 %v3112_v23, %v1166_v8  ;;  %v1593_v1 = vadd.f32 %v3112_v23, %v1592_v0  ;;  %v3821_v11 = vmax.f32 %v3819_v49, %v3820_v4  ;;  %v3822_v0 = vld [vmem:[#allocation12_spill] sm:$0xff] }
 0x156   :  { %v1718_v42 = vmax.f32 %v1682_v34, 0.0  ;;  %v1258_v21 = vmax.f32 %v3806_v62, %v1172_v52  ;;  %v3825_v62 = vld [vmem:[#allocation14_spill] sm:$0xff] }
 0x157   :  { %v1717_v26 = vmax.f32 %v1681_v38, 0.0  ;;  %v1257_v3 = vmax.f32 %v3809_v2, %v1167_v39  ;;  %v2361_v6 = vpop.f32.mrb[60].mxu0  ;;  %v2423_v45 = vpop.f32.mrb[60].mxu1  ;;  %v3823_v38 = vld [vmem:[#allocation13_spill] sm:$0xff] }
 0x158   :  { %1755 = vst.msk [vmem:[%s3729_s3 + $0xa8] sm:$0xff] %vm1733_vm4, %v1718_v42  ;;  %v1684_v48 = vmax.f32 %v1258_v21, %v1598_v53  ;;  %v1182_v55 = vadd.f32 %v2361_v6, %v3112_v23  ;;  %v1176_v58 = vpop.f32.mrb[61].mxu0  ;;  %v1608_v7 = vadd.f32 %v2423_v45, %v3112_v23  ;;  %v1602_v19 = vpop.f32.mrb[61].mxu1  ;;  %v3824_v39 = vmax.f32 %v3822_v0, %v3823_v38  ;;  %v3826_v21 = vld [vmem:[#allocation15_spill] sm:$0xff] }
 0x159   :  { %1754 = vst.msk [vmem:[%s3729_s3 + $0xa0] sm:$0xff] %vm1733_vm4, %v1717_v26  ;;  %v1683_v28 = vmax.f32 %v1257_v3, %v1593_v1  ;;  %v1177_v31 = vadd.f32 %v3112_v23, %v1176_v58  ;;  %v1603_v46 = vadd.f32 %v3112_v23, %v1602_v19  ;;  %v3827_v26 = vmax.f32 %v3825_v62, %v3826_v21 }
 0x15a   :  { %v1720_v47 = vmax.f32 %v1684_v48, 0.0  ;;  %v1260_v54 = vmax.f32 %v3812_v14, %v1182_v55  ;;  %v3831_v14 = vld [vmem:[#allocation18_spill] sm:$0xff] }
 0x15b   :  { %v1719_v59 = vmax.f32 %v1683_v28, 0.0  ;;  %v1259_v5 = vmax.f32 %v3815_v33, %v1177_v31  ;;  %v2364_v10 = vpop.f32.mrb[62].mxu0  ;;  %v2426_v15 = vpop.f32.mrb[62].mxu1  ;;  %v3828_v31 = vld [vmem:[#allocation16_spill] sm:$0xff] }
 0x15c   :  { %1757 = vst.msk [vmem:[%s3729_s3 + $0xb8] sm:$0xff] %vm1733_vm4, %v1720_v47  ;;  %v1686_v20 = vmax.f32 %v1260_v54, %v1608_v7  ;;  %v1192_v43 = vadd.f32 %v2364_v10, %v3112_v23  ;;  %v1186_v12 = vpop.f32.mrb[63].mxu0  ;;  %v1618_v13 = vadd.f32 %v2426_v15, %v3112_v23  ;;  %v1612_v16 = vpop.f32.mrb[63].mxu1  ;;  %v3832_v54 = vld [vmem:[#allocation19_spill] sm:$0xff] }
 0x15d   :  { %1756 = vst.msk [vmem:[%s3729_s3 + $0xb0] sm:$0xff] %vm1733_vm4, %v1719_v59  ;;  %v1685_v17 = vmax.f32 %v1259_v5, %v1603_v46  ;;  %v1187_v63 = vadd.f32 %v3112_v23, %v1186_v12  ;;  %v1613_v9 = vadd.f32 %v3112_v23, %v1612_v16  ;;  %v3829_v46 = vld [vmem:[#allocation17_spill] sm:$0xff]  ;;  %v3833_v59 = vmax.f32 %v3831_v14, %v3832_v54 }
 0x15e   :  { %v1722_v36 = vmax.f32 %v1686_v20, 0.0  ;;  %v1262_v57 = vmax.f32 %v3818_v56, %v1192_v43  ;;  %v3830_v47 = vmax.f32 %v3828_v31, %v3829_v46  ;;  %v3837_v56 = vld [vmem:[#allocation22_spill] sm:$0xff] }
 0x15f   :  { %v1721_v44 = vmax.f32 %v1685_v17, 0.0  ;;  %v1261_v60 = vmax.f32 %v3821_v11, %v1187_v63  ;;  %v2367_v61 = vpop.f32.mrb[64].mxu0  ;;  %v2429_v41 = vpop.f32.mrb[64].mxu1  ;;  %v3834_v63 = vld [vmem:[#allocation20_spill] sm:$0xff] }
 0x160   :  { %1759 = vst.msk [vmem:[%s3729_s3 + $0xc8] sm:$0xff] %vm1733_vm4, %v1722_v36  ;;  %v1688_v25 = vmax.f32 %v1262_v57, %v1618_v13  ;;  %v1202_v18 = vadd.f32 %v2367_v61, %v3112_v23  ;;  %v1196_v22 = vpop.f32.mrb[65].mxu0  ;;  %v1628_v24 = vadd.f32 %v2429_v41, %v3112_v23  ;;  %v1622_v29 = vpop.f32.mrb[65].mxu1  ;;  %v3838_v57 = vld [vmem:[#allocation23_spill] sm:$0xff] }
 0x161   :  { %1758 = vst.msk [vmem:[%s3729_s3 + $0xc0] sm:$0xff] %vm1733_vm4, %v1721_v44  ;;  %v1687_v34 = vmax.f32 %v1261_v60, %v1613_v9  ;;  %v1197_v52 = vadd.f32 %v3112_v23, %v1196_v22  ;;  %v1623_v8 = vadd.f32 %v3112_v23, %v1622_v29  ;;  %v3835_v9 = vld [vmem:[#allocation21_spill] sm:$0xff]  ;;  %v3839_v44 = vmax.f32 %v3837_v56, %v3838_v57 }
 0x162   :  { %v1724_v53 = vmax.f32 %v1688_v25, 0.0  ;;  %v1264_v1 = vmax.f32 %v3824_v39, %v1202_v18  ;;  %v3836_v36 = vmax.f32 %v3834_v63, %v3835_v9  ;;  %v3843_v39 = vld [vmem:[#allocation26_spill] sm:$0xff] }
 0x163   :  { %v1723_v42 = vmax.f32 %v1687_v34, 0.0  ;;  %v1263_v27 = vmax.f32 %v3827_v26, %v1197_v52  ;;  %v2370_v30 = vpop.f32.mrb[66].mxu0  ;;  %v2432_v2 = vpop.f32.mrb[66].mxu1  ;;  %v3840_v52 = vld [vmem:[#allocation24_spill] sm:$0xff] }
 0x164   :  { %1761 = vst.msk [vmem:[%s3729_s3 + $0xd8] sm:$0xff] %vm1733_vm4, %v1724_v53  ;;  %v1690_v3 = vmax.f32 %v1264_v1, %v1628_v24  ;;  %v1212_v6 = vadd.f32 %v2370_v30, %v3112_v23  ;;  %v1206_v45 = vpop.f32.mrb[67].mxu0  ;;  %v1638_v48 = vadd.f32 %v2432_v2, %v3112_v23  ;;  %v1632_v55 = vpop.f32.mrb[67].mxu1  ;;  %v3844_v1 = vld [vmem:[#allocation27_spill] sm:$0xff] }
 0x165   :  { %1760 = vst.msk [vmem:[%s3729_s3 + $0xd0] sm:$0xff] %vm1733_vm4, %v1723_v42  ;;  %v1689_v58 = vmax.f32 %v1263_v27, %v1623_v8  ;;  %v1207_v7 = vadd.f32 %v3112_v23, %v1206_v45  ;;  %v1633_v19 = vadd.f32 %v3112_v23, %v1632_v55  ;;  %v3841_v8 = vld [vmem:[#allocation25_spill] sm:$0xff]  ;;  %v3845_v42 = vmax.f32 %v3843_v39, %v3844_v1 }
 0x166   :  { %v1726_v28 = vmax.f32 %v1690_v3, 0.0  ;;  %v1266_v50 = vmax.f32 %v3830_v47, %v1212_v6  ;;  %v3842_v53 = vmax.f32 %v3840_v52, %v3841_v8 }
 0x167   :  { %v1725_v51 = vmax.f32 %v1689_v58, 0.0  ;;  %v1265_v32 = vmax.f32 %v3833_v59, %v1207_v7  ;;  %v2373_v35 = vpop.f32.mrb[68].mxu0  ;;  %v2435_v33 = vpop.f32.mrb[68].mxu1 }
 0x168   :  { %1763 = vst.msk [vmem:[%s3729_s3 + $0xe8] sm:$0xff] %vm1733_vm4, %v1726_v28  ;;  %v1692_v5 = vmax.f32 %v1266_v50, %v1638_v48  ;;  %v1222_v10 = vadd.f32 %v2373_v35, %v3112_v23  ;;  %v1216_v15 = vpop.f32.mrb[69].mxu0  ;;  %v1648_v20 = vadd.f32 %v2435_v33, %v3112_v23  ;;  %v1642_v43 = vpop.f32.mrb[69].mxu1 }
 0x169   :  { %1762 = vst.msk [vmem:[%s3729_s3 + $0xe0] sm:$0xff] %vm1733_vm4, %v1725_v51  ;;  %v1691_v12 = vmax.f32 %v1265_v32, %v1633_v19  ;;  %v1217_v13 = vadd.f32 %v3112_v23, %v1216_v15  ;;  %v1643_v16 = vadd.f32 %v3112_v23, %v1642_v43 }
 0x16a   :  { %v1728_v17 = vmax.f32 %v1692_v5, 0.0  ;;  %v1268_v37 = vmax.f32 %v3836_v36, %v1222_v10 }
 0x16b   :  { %v1727_v40 = vmax.f32 %v1691_v12, 0.0  ;;  %v1267_v49 = vmax.f32 %v3839_v44, %v1217_v13  ;;  %v2376_v4 = vpop.f32.mrb[70].mxu0  ;;  %v2438_v11 = vpop.f32.mrb[70].mxu1 }
 0x16c   :  { %1765 = vst.msk [vmem:[%s3729_s3 + $0xf8] sm:$0xff] %vm1733_vm4, %v1728_v17  ;;  %v1694_v60 = vmax.f32 %v1268_v37, %v1648_v20  ;;  %v1232_v61 = vadd.f32 %v2376_v4, %v3112_v23  ;;  %v1226_v41 = vpop.f32.mrb[71].mxu0  ;;  %v1658_v25 = vadd.f32 %v2438_v11, %v3112_v23  ;;  %v1652_v18 = vpop.f32.mrb[71].mxu1 }
 0x16d   :  { %1764 = vst.msk [vmem:[%s3729_s3 + $0xf0] sm:$0xff] %vm1733_vm4, %v1727_v40  ;;  %v1693_v22 = vmax.f32 %v1267_v49, %v1643_v16  ;;  %v1227_v24 = vadd.f32 %v3112_v23, %v1226_v41  ;;  %v1653_v29 = vadd.f32 %v3112_v23, %v1652_v18 }
 0x16e   :  { %v1730_v34 = vmax.f32 %v1694_v60, 0.0  ;;  %v1270_v0 = vmax.f32 %v3842_v53, %v1232_v61 }
 0x16f   :  { %v1729_v38 = vmax.f32 %v1693_v22, 0.0  ;;  %v1269_v62 = vmax.f32 %v3845_v42, %v1227_v24 }
 0x170   :  { %1767 = vst.msk [vmem:[%s3729_s3 + $0x108] sm:$0xff] %vm1733_vm4, %v1730_v34  ;;  %v1696_v21 = vmax.f32 %v1270_v0, %v1658_v25 }
 0x171   :  { %1766 = vst.msk [vmem:[%s3729_s3 + $0x100] sm:$0xff] %vm1733_vm4, %v1729_v38  ;;  %v1695_v23 = vmax.f32 %v1269_v62, %v1653_v29 }
 0x172   :  { %v1732_v26 = vmax.f32 %v1696_v21, 0.0 }
 0x173   :  { %v1731_v27 = vmax.f32 %v1695_v23, 0.0 }
 0x174   :  { %1769 = vst.msk [vmem:[%s3729_s3 + $0x118] sm:$0xff] %vm1733_vm4, %v1732_v26 }
 0x175   :  { %1768 = vst.msk [vmem:[%s3729_s3 + $0x110] sm:$0xff] %vm1733_vm4, %v1731_v27 }

// kernel: net_forward.5
= control target key start
LH: loop header
LB: loop body
LE: loop exit
PB: predicated region body
PF: predicated region fallthrough
CT: control target
= control target key end

     0   :  { %v32_v0 = vlaneseq  ;;  %v533_v1 = vmov 1983009808   ;;  %s776_s0 = inlined_call_operand.vmem [shape: f32[2,256], index: 0, kind: input, shape index: {}]   ;;  %s777_s1 = inlined_call_operand.vmem [shape: f32[1,256], index: 1, kind: input, shape index: {}]   ;;  %s778_s2 = inlined_call_operand.vmem [shape: f32[1,256], index: 2, kind: input, shape index: {}]   ;;  %s779_s3 = inlined_call_operand.vmem [shape: f32[256,128], index: 3, kind: input, shape index: {}]   ;;  %s780_s4 = inlined_call_operand.vmem [shape: f32[1,128], index: 4, kind: input, shape index: {}]   ;;  %s781_s5 = inlined_call_operand.vmem [shape: f32[128,128], index: 5, kind: input, shape index: {}]   ;;  %s782_s6 = inlined_call_operand.vmem [shape: f32[1,128], index: 6, kind: input, shape index: {}]   ;;  %s783_s7 = inlined_call_operand.hbm [shape: f32[2,128], index: 7, kind: output, shape index: {}]  }
   0x1   :  { %v30_v2 = vunpack.c.l.s4 %v533_v1 }
   0x2   :  { %12 = vsyncpa [#allocation3], 0  ;;  %v579_v3 = vshrl.u32 %v32_v0, 7  ;;  %v27_v5 = vld [vmem:[%s776_s0] sm:$0xf]  ;;  %vm39_vm0 = vcmask 1041408  }
   0x3   :  { %v31_v4 = vunpack.c.0.s8 %v30_v2  ;;  %v143_v12 = vld [vmem:[%s779_s3 + $0x80] sm:$0xff]  ;;  %v144_v13 = vld [vmem:[%s779_s3 + $0x88] sm:$0xff]  ;;  %v534_v18 = vmov 269488144   ;;  %v145_v32 = vld [vmem:[%s779_s3 + $0x90] sm:$0xff]  ;;  %vm536_vm1 = vmmov 0  }
   0x4   :  { %v127_v14 = vld [vmem:[%s779_s3] sm:$0xff]  ;;  %v445_v15 = vpack.c.bf16 %v144_v13, %v143_v12  ;;  %v128_v16 = vld [vmem:[%s779_s3 + $0x8] sm:$0xff]  ;;  %v49_v19 = vunpack.c.l.s4 %v534_v18  ;;  %v146_v33 = vld [vmem:[%s779_s3 + $0x98] sm:$0xff] }
   0x5   :  { %v585_v6 = vsub.s32 %v31_v4, %v579_v3  ;;  %v447_v17 = vpack.c.bf16 %v128_v16, %v127_v14  ;;  %v449_v34 = vpack.c.bf16 %v146_v33, %v145_v32  ;;  %v129_v35 = vld [vmem:[%s779_s3 + $0x10] sm:$0xff]  ;;  %v130_v36 = vld [vmem:[%s779_s3 + $0x18] sm:$0xff]  ;;  %v147_v38 = vld [vmem:[%s779_s3 + $0xa0] sm:$0xff] }
   0x6   :  { %446 = vmatprep.subr.bf16.mxu0 %v445_v15  ;;  %v50_v20 = vunpack.c.0.s8 %v49_v19  ;;  %v451_v37 = vpack.c.bf16 %v130_v36, %v129_v35  ;;  %v148_v39 = vld [vmem:[%s779_s3 + $0xa8] sm:$0xff]  ;;  %v131_v41 = vld [vmem:[%s779_s3 + $0x20] sm:$0xff]  ;;  %v149_v44 = vld [vmem:[%s779_s3 + $0xb0] sm:$0xff]  ;;  %v535_v15 = vmov 0.0|0.0   ;;  %v91_v36 = vsub.s32 0, %v579_v3 }
   0x7   :  { %v35_v7 = vrot.slane %v27_v5, %v585_v6  ;;  %448 = vmatpush3.bf16.msra.mxu0 %v447_v17  ;;  %v453_v40 = vpack.c.bf16 %v148_v39, %v147_v38  ;;  %v132_v42 = vld [vmem:[%s779_s3 + $0x28] sm:$0xff]  ;;  %v150_v45 = vld [vmem:[%s779_s3 + $0xb8] sm:$0xff]  ;;  %v133_v46 = vld [vmem:[%s779_s3 + $0x30] sm:$0xff]  ;;  %477 = vmatprep.subr.bf16.mxu1 %v535_v15 }
   0x8   :  { %v603_v21 = vsub.s32 %v50_v20, %v579_v3  ;;  %450 = vmatprep.subr.bf16.mxu0 %v449_v34  ;;  %v455_v43 = vpack.c.bf16 %v132_v42, %v131_v41  ;;  %v457_v47 = vpack.c.bf16 %v150_v45, %v149_v44  ;;  %v134_v48 = vld [vmem:[%s779_s3 + $0x38] sm:$0xff]  ;;  %v151_v49 = vld [vmem:[%s779_s3 + $0xc0] sm:$0xff]  ;;  %v152_v50 = vld [vmem:[%s779_s3 + $0xc8] sm:$0xff] }
   0x9   :  { %v36_v8 = vcombine.high %v35_v7, %v35_v7  ;;  %v40_v9 = vsel %vm39_vm0, %v35_v7, 0.0  ;;  %v459_v51 = vpack.c.bf16 %v134_v48, %v133_v46  ;;  %v461_v52 = vpack.c.bf16 %v152_v50, %v151_v49  ;;  %v135_v53 = vld [vmem:[%s779_s3 + $0x40] sm:$0xff]  ;;  %v136_v54 = vld [vmem:[%s779_s3 + $0x48] sm:$0xff]  ;;  %v153_v55 = vld [vmem:[%s779_s3 + $0xd0] sm:$0xff] }
   0xa   :  { %v154_v56 = vld [vmem:[%s779_s3 + $0xd8] sm:$0xff]  ;;  %v463_v57 = vpack.c.bf16 %v136_v54, %v135_v53  ;;  %v137_v59 = vld [vmem:[%s779_s3 + $0x50] sm:$0xff]  ;;  %v155_v61 = vld [vmem:[%s779_s3 + $0xe0] sm:$0xff] }
   0xb   :  { %v41_v10 = vsel %vm39_vm0, %v36_v8, 0.0  ;;  %452 = vmatpush3.bf16.msra.mxu0 %v451_v37  ;;  %v465_v58 = vpack.c.bf16 %v154_v56, %v153_v55  ;;  %v138_v60 = vld [vmem:[%s779_s3 + $0x58] sm:$0xff]  ;;  %v156_v62 = vld [vmem:[%s779_s3 + $0xe8] sm:$0xff]  ;;  %v139_v1 = vld [vmem:[%s779_s3 + $0x60] sm:$0xff]  ;;  %v95_v37 = vsub.s32 1, %v579_v3 }
   0xc   :  { %v42_v11 = vadd.f32 %v41_v10, %v40_v9  ;;  %454 = vmatprep.subr.bf16.mxu0 %v453_v40  ;;  %v467_v63 = vpack.c.bf16 %v138_v60, %v137_v59  ;;  %v469_v0 = vpack.c.bf16 %v156_v62, %v155_v61  ;;  %v140_v2 = vld [vmem:[%s779_s3 + $0x68] sm:$0xff]  ;;  %v157_v4 = vld [vmem:[%s779_s3 + $0xf0] sm:$0xff]  ;;  %v142_v10 = vld [vmem:[%s779_s3 + $0x78] sm:$0xff] }
   0xd   :  { %v471_v7 = vpack.c.bf16 %v140_v2, %v139_v1  ;;  %v141_v9 = vld [vmem:[%s779_s3 + $0x70] sm:$0xff]  ;;  %v248_v12 = vld [vmem:[%s781_s5] sm:$0xff]  ;;  %v249_v13 = vld [vmem:[%s781_s5 + $0x8] sm:$0xff] }
   0xe   :  { %43 = vadd.xlane.f32.xlu0 %v42_v11  ;;  %v475_v11 = vpack.c.bf16 %v142_v10, %v141_v9  ;;  %v250_v14 = vld [vmem:[%s781_s5 + $0x10] sm:$0xff]  ;;  %v478_v16 = vpack.c.bf16 %v249_v13, %v248_v12  ;;  %v251_v17 = vld [vmem:[%s781_s5 + $0x18] sm:$0xff]  ;;  %v252_v19 = vld [vmem:[%s781_s5 + $0x20] sm:$0xff] }
   0xf   :  { %456 = vmatpush3.bf16.msra.mxu0 %v455_v43  ;;  %v481_v18 = vpack.c.bf16 %v251_v17, %v250_v14  ;;  %v253_v20 = vld [vmem:[%s781_s5 + $0x28] sm:$0xff]  ;;  %v87_v38 = vld [vmem:[%s777_s1] sm:$0x3] }
  0x10   :  { %458 = vmatprep.subr.bf16.mxu0 %v457_v47  ;;  %479 = vmatpush3.bf16.msra.mxu1 %v478_v16  ;;  %v107_v39 = vld [vmem:[%s778_s2] sm:$0x3]  ;;  %v92_v40 = vrot.slane %v87_v38, %v91_v36  ;;  %v96_v41 = vrot.slane %v87_v38, %v95_v37 }
  0x11   :  { %480 = vmatprep.subr.bf16.mxu1 %v535_v15  ;;  %v112_v42 = vrot.slane %v107_v39, %v91_v36  ;;  %v116_v43 = vrot.slane %v107_v39, %v95_v37  ;;  %v260_v54 = vld [vmem:[%s781_s5 + $0x60] sm:$0xff] }
  0x12   :  { %v97_v44 = vcombine.low %v92_v40, %v96_v41  ;;  %v356_v59 = vld [vmem:[%s780_s4] ss:$0 sm:$0xff] }
  0x13   :  { %460 = vmatpush3.bf16.msra.mxu0 %v459_v51  ;;  %v117_v45 = vcombine.low %v112_v42, %v116_v43 }
  0x14   :  { %462 = vmatprep.subr.bf16.mxu0 %v461_v52  ;;  %482 = vmatpush3.bf16.msra.mxu1 %v481_v18  ;;  %v104_v3 = vrot.slane %v97_v44, %v585_v6 }
  0x15   :  { %483 = vmatprep.subr.bf16.mxu1 %v535_v15  ;;  %v124_v49 = vrot.slane %v117_v45, %v585_v6 }
  0x17   :  { %464 = vmatpush3.bf16.msra.mxu0 %v463_v57  ;;  %v537_v57 = vmov 0.0  }
  0x18   :  { %466 = vmatprep.subr.bf16.mxu0 %v465_v58  ;;  %442 = vmatprep.mubr.msk.f32.mxu1 %vm536_vm1, %v537_v57 }
  0x1b   :  { %468 = vmatpush3.bf16.msra.mxu0 %v467_v63 }
  0x1c   :  { %470 = vmatprep.subr.bf16.mxu0 %v469_v0  ;;  %v357_v0 = vld [vmem:[%s782_s6] ss:$0 sm:$0xff] }
  0x1f   :  { %472 = vmatpush3.bf16.msra.mxu0 %v471_v7 }
  0x9b   :  { %v44_v22 = vpop.xlane.xlu0 %43 }
  0x9c   :  { %v46_v23 = vmul.f32 0.00390625, %v44_v22  ;;  %v484_v22 = vpack.c.bf16 %v253_v20, %v252_v19 }
  0x9e   :  { %v54_v24 = vrot.slane %v46_v23, %v603_v21  ;;  %v254_v23 = vld [vmem:[%s781_s5 + $0x30] sm:$0xff]  ;;  %485 = vmatpush3.bf16.msra.mxu1 %v484_v22 }
  0x9f   :  { %486 = vmatprep.subr.bf16.mxu1 %v535_v15 }
  0xa0   :  { %v606_v25 = vsub.f32 %v27_v5, %v54_v24  ;;  %v158_v5 = vld [vmem:[%s779_s3 + $0xf8] sm:$0xff] }
  0xa1   :  { %v473_v8 = vpack.c.bf16 %v158_v5, %v157_v4  ;;  %v255_v24 = vld [vmem:[%s781_s5 + $0x38] sm:$0xff] }
  0xa2   :  { %v57_v26 = vmul.f32 %v606_v25, %v606_v25 }
  0xa3   :  { %474 = vmatprep.subr.bf16.mxu0 %v473_v8 }
  0xa4   :  { %v65_v27 = vrot.slane %v57_v26, %v585_v6  ;;  %476 = vmatpush3.bf16.msra.mxu0 %v475_v11  ;;  %v487_v26 = vpack.c.bf16 %v255_v24, %v254_v23 }
  0xa6   :  { %v66_v28 = vcombine.high %v65_v27, %v65_v27  ;;  %v69_v29 = vsel %vm39_vm0, %v65_v27, 0.0  ;;  %v256_v27 = vld [vmem:[%s781_s5 + $0x40] sm:$0xff]  ;;  %488 = vmatpush3.bf16.msra.mxu1 %v487_v26 }
  0xa7   :  { %489 = vmatprep.subr.bf16.mxu1 %v535_v15 }
  0xa8   :  { %v70_v30 = vsel %vm39_vm0, %v66_v28, 0.0  ;;  %v257_v28 = vld [vmem:[%s781_s5 + $0x48] sm:$0xff] }
  0xa9   :  { %v71_v31 = vadd.f32 %v70_v30, %v69_v29  ;;  %v490_v29 = vpack.c.bf16 %v257_v28, %v256_v27  ;;  %v258_v30 = vld [vmem:[%s781_s5 + $0x50] sm:$0xff] }
  0xab   :  { %72 = vadd.xlane.f32.xlu0 %v71_v31  ;;  %v259_v31 = vld [vmem:[%s781_s5 + $0x58] sm:$0xff]  ;;  %491 = vmatpush3.bf16.msra.mxu1 %v490_v29 }
  0xac   :  { %v493_v32 = vpack.c.bf16 %v259_v31, %v258_v30  ;;  %492 = vmatprep.subr.bf16.mxu1 %v535_v15 }
  0xaf   :  { %494 = vmatpush3.bf16.msra.mxu1 %v493_v32 }
  0xb0   :  { %495 = vmatprep.subr.bf16.mxu1 %v535_v15 }
 0x138   :  { %v73_v33 = vpop.xlane.xlu0 %72 }
 0x139   :  { %v74_v34 = vmul.f32 0.00390625, %v73_v33 }
 0x13b   :  { %v75_v35 = vadd.f32 1e-05, %v74_v34 }
 0x13d   :  { %507 = vrsqrt.f32 %v75_v35 }
 0x147   :  { %v508_v46 = vpop.eup %507 }
 0x148   :  { %v84_v47 = vrot.slane %v508_v46, %v603_v21  ;;  %v261_v21 = vld [vmem:[%s781_s5 + $0x68] sm:$0xff] }
 0x149   :  { %v496_v55 = vpack.c.bf16 %v261_v21, %v260_v54 }
 0x14a   :  { %v86_v48 = vmul.f32 %v84_v47, %v606_v25  ;;  %v262_v25 = vld [vmem:[%s781_s5 + $0x70] sm:$0xff] }
 0x14b   :  { %497 = vmatpush3.bf16.msra.mxu1 %v496_v55 }
 0x14c   :  { %v106_v50 = vmul.f32 %v104_v3, %v86_v48  ;;  %498 = vmatprep.subr.bf16.mxu1 %v535_v15 }
 0x14e   :  { %v126_v51 = vadd.f32 %v124_v49, %v106_v50 }
 0x150   :  { %v173_v52 = vrot.slane %v126_v51, %v585_v6  ;;  %v263_v6 = vld [vmem:[%s781_s5 + $0x78] sm:$0xff]  ;;  %s538_s5 = smov [#allocation2]  }
 0x151   :  { %v499_v56 = vpack.c.bf16 %v263_v6, %v262_v25  ;;  %s348_s0 = sshll.u32 %s538_s5, 4  ;;  %s349_s0 = int_to_ptr.vmem [resolvable:$true] %s348_s0 }
 0x152   :  { %v174_v53 = vcombine.high %v173_v52, %v173_v52  ;;  %s509_s30 = scalar_lea.vmem %s349_s0, 32  ;;  %p514_p1 = scmp.lt.s32.totalorder %s349_s0, %s349_s0 }
 0x153   :  { %500 = vmatpush3.bf16.msra.mxu1 %v499_v56  ;;  %p510_p0 = scmp.ne.s32.totalorder %s349_s0, %s509_s30  ;;  %p515_p2 = scmp.lt.s32.totalorder %s509_s30, %s509_s30 }
 0x154   :  { %241 = vmatprep.mubr.f32.mxu0 %v174_v53 }
 0x155   :  { %242 = vmatmul.mubr.f32.vlgmr.msra.gmra.mrb[0].mxu0 %v173_v52  ;;  %p516_p3 = por %p515_p2, %p514_p1 }
 0x157   :  { %p517_p4 = pnand %p516_p3, %p510_p0 }
 0x228   :  { %v390_v58 = vpop.f32.mrb[0].mxu0 }
 0x229   :  { %v391_v60 = vpop.f32.mrb[1].mxu0 }
 0x22a   :  { %v392_v61 = vadd.f32 %v391_v60, %v390_v58 }
 0x22c   :  { %v244_v62 = vadd.f32 %v392_v61, %v356_v59 }
 0x22e   :  { %v247_v63 = vmax.f32 %v244_v62, 0.0 }
 0x230   :  { %443 = vmatmul.mubr.f32.vlgmr.msra.gmra.mrb[0].mxu1 %v247_v63 }
 0x303   :  { %v337_v1 = vpop.f32.mrb[0].mxu1 }
 0x304   :  { %v338_v2 = vadd.f32 %v357_v0, %v337_v1  ;;  %v444_v4 = vpop.f32.mrb[1].mxu1 }
 0x306   :  { %341 = vst [vmem:[#allocation2] sm:$0x3] %v338_v2 }
 0x307   :  { %520 = shalt.err (!%p517_p4)
}
 0x308   :  { %s521_s9 = scalar_lea.hbm %s783_s7, 32 }
 0x309   :  { %p522_p5 = scmp.ne.s32.totalorder %s783_s7, %s521_s9  ;;  %p525_p6 = scmp.lt.u32.totalorder %s521_s9, %s783_s7 }
 0x30b   :  { %p527_p7 = pnand %p525_p6, %p522_p5 }
 0x30d   :  { %530 = shalt.err (!%p527_p7)
}
 0x30e   :  { %351 = dma.vmem_to_hbm [thread:$0]  %s349_s0, 32, %s783_s7, [#allocation3]  }
 0x30f   :  { %531 = dma.done.wait [#allocation3], 32  }
 0x310   :  { %532 = vsyncadd [#allocation3], 4294967264 }
 0x311   :  { %355 = vsyncpa [#allocation3], 1 }

// kernel: net_forward.4
= control target key start
LH: loop header
LB: loop body
LE: loop exit
PB: predicated region body
PF: predicated region fallthrough
CT: control target
= control target key end

     0   :  { %v648_v0 = vmov 0.0|0.0   ;;  %vm48_vm0 = vcmask 179200   ;;  %v649_v30 = vmov 0.0   ;;  %vm61_vm1 = vcmask 1045504   ;;  %s980_s1 = inlined_call_operand.vmem [shape: f32[150,16], index: 1, kind: input, shape index: {}]   ;;  %s981_s0 = inlined_call_operand.vmem [shape: f32[4,32,150], index: 0, kind: input, shape index: {}]   ;;  %s982_s2 = inlined_call_operand.vmem [shape: f32[1,16], index: 2, kind: input, shape index: {}]   ;;  %s983_s3 = inlined_call_operand.vmem [shape: f32[32,16], index: 3, kind: output, shape index: {}]  }
   0x1   :  { %538 = vmatprep.subr.bf16.mxu0 %v648_v0  ;;  %v14_v1 = vld [vmem:[%s980_s1] sm:$0xff]  ;;  %v15_v2 = vld [vmem:[%s980_s1 + $0x8] sm:$0xff]  ;;  %565 = vmatprep.subr.bf16.mxu1 %v648_v0  ;;  %v16_v3 = vld [vmem:[%s980_s1 + $0x10] sm:$0xff]  ;;  %vm484_vm2 = vcmask 130048  }
   0x2   :  { %v681_v4 = vpack.c.bf16 %v15_v2, %v14_v1  ;;  %v17_v5 = vld [vmem:[%s980_s1 + $0x18] sm:$0xff]  ;;  %v18_v7 = vld [vmem:[%s980_s1 + $0x20] sm:$0xff]  ;;  %v19_v8 = vld [vmem:[%s980_s1 + $0x28] sm:$0xff] }
   0x3   :  { %v688_v6 = vpack.c.bf16 %v17_v5, %v16_v3  ;;  %v35_v9 = vld [vmem:[%s981_s0 + $0x8] sm:$0xff]  ;;  %v703_v10 = vpack.c.bf16 %v19_v8, %v18_v7  ;;  %v20_v12 = vld [vmem:[%s980_s1 + $0x30] sm:$0xff]  ;;  %v21_v13 = vld [vmem:[%s980_s1 + $0x38] sm:$0xff] }
   0x4   :  { %540 = vmatpush1.bf16.msra.mxu0 %v681_v4  ;;  %567 = vmatpush1.bf16.msra.mxu1 %v681_v4  ;;  %v500_v11 = vld [vmem:[%s981_s0 + $0x48] sm:$0xff]  ;;  %v720_v14 = vpack.c.bf16 %v21_v13, %v20_v12  ;;  %v22_v15 = vld [vmem:[%s980_s1 + $0x40] sm:$0xff]  ;;  %v24_v18 = vld [vmem:[%s980_s1 + $0x50] sm:$0xff] }
   0x5   :  { %541 = vmatprep.subr.bf16.mxu0 %v648_v0  ;;  %568 = vmatprep.subr.bf16.mxu1 %v648_v0  ;;  %v23_v16 = vld [vmem:[%s980_s1 + $0x48] sm:$0xff]  ;;  %v25_v19 = vld [vmem:[%s980_s1 + $0x58] sm:$0xff]  ;;  %v26_v21 = vld [vmem:[%s980_s1 + $0x60] sm:$0xff] }
   0x6   :  { %495 = vmatprep.mubr.msk.f32.mxu0 %vm48_vm0, %v35_v9  ;;  %508 = vmatprep.mubr.msk.f32.mxu1 %vm48_vm0, %v500_v11  ;;  %v732_v17 = vpack.c.bf16 %v23_v16, %v22_v15  ;;  %v744_v20 = vpack.c.bf16 %v25_v19, %v24_v18  ;;  %v27_v22 = vld [vmem:[%s980_s1 + $0x68] sm:$0xff]  ;;  %v28_v24 = vld [vmem:[%s980_s1 + $0x70] sm:$0xff]  ;;  %v29_v25 = vld [vmem:[%s980_s1 + $0x78] sm:$0xff] }
   0x7   :  { %v756_v23 = vpack.c.bf16 %v27_v22, %v26_v21  ;;  %v768_v26 = vpack.c.bf16 %v29_v25, %v28_v24  ;;  %v30_v27 = vld [vmem:[%s980_s1 + $0x80] sm:$0xff]  ;;  %v31_v28 = vld [vmem:[%s980_s1 + $0x88] sm:$0xff]  ;;  %v790_v31 = vld [vmem:[%s980_s1 + $0x90] sm:$0x3f] }
   0x8   :  { %543 = vmatpush1.bf16.msra.mxu0 %v688_v6  ;;  %570 = vmatpush1.bf16.msra.mxu1 %v688_v6  ;;  %v780_v29 = vpack.c.bf16 %v31_v28, %v30_v27  ;;  %v34_v32 = vld [vmem:[%s981_s0] sm:$0xff]  ;;  %v37_v34 = vld [vmem:[%s981_s0 + $0x18] sm:$0xff]  ;;  %v36_v35 = vld [vmem:[%s981_s0 + $0x10] sm:$0xff] }
   0x9   :  { %544 = vmatprep.subr.bf16.mxu0 %v648_v0  ;;  %571 = vmatprep.subr.bf16.mxu1 %v648_v0  ;;  %v499_v33 = vld [vmem:[%s981_s0 + $0x40] sm:$0xff]  ;;  %v502_v36 = vld [vmem:[%s981_s0 + $0x58] sm:$0xff]  ;;  %v501_v37 = vld [vmem:[%s981_s0 + $0x50] sm:$0xff] }
   0xa   :  { %v39_v38 = vld [vmem:[%s981_s0 + $0x28] sm:$0xff]  ;;  %v38_v39 = vld [vmem:[%s981_s0 + $0x20] sm:$0xff]  ;;  %v41_v42 = vld [vmem:[%s981_s0 + $0x38] sm:$0xff] }
   0xb   :  { %v504_v40 = vld [vmem:[%s981_s0 + $0x68] sm:$0xff]  ;;  %v503_v41 = vld [vmem:[%s981_s0 + $0x60] sm:$0xff]  ;;  %v40_v43 = vld [vmem:[%s981_s0 + $0x30] sm:$0xff] }
   0xc   :  { %546 = vmatpush1.bf16.msra.mxu0 %v703_v10  ;;  %573 = vmatpush1.bf16.msra.mxu1 %v703_v10  ;;  %v506_v44 = vld [vmem:[%s981_s0 + $0x78] sm:$0xff]  ;;  %v505_v45 = vld [vmem:[%s981_s0 + $0x70] sm:$0xff]  ;;  %v513_v46 = vld [vmem:[%s981_s0 + $0x88] sm:$0xff] }
   0xd   :  { %547 = vmatprep.subr.bf16.mxu0 %v648_v0  ;;  %574 = vmatprep.subr.bf16.mxu1 %v648_v0  ;;  %v526_v47 = vld [vmem:[%s981_s0 + $0xc8] sm:$0xff]  ;;  %v512_v48 = vld [vmem:[%s981_s0 + $0x80] sm:$0xff]  ;;  %v515_v49 = vld [vmem:[%s981_s0 + $0x98] sm:$0xff] }
   0xe   :  { %v525_v50 = vld [vmem:[%s981_s0 + $0xc0] sm:$0xff]  ;;  %v528_v51 = vld [vmem:[%s981_s0 + $0xd8] sm:$0xff]  ;;  %v514_v52 = vld [vmem:[%s981_s0 + $0x90] sm:$0xff] }
   0xf   :  { %v517_v53 = vld [vmem:[%s981_s0 + $0xa8] sm:$0xff]  ;;  %v527_v54 = vld [vmem:[%s981_s0 + $0xd0] sm:$0xff]  ;;  %v516_v56 = vld [vmem:[%s981_s0 + $0xa0] sm:$0xff] }
  0x10   :  { %549 = vmatpush1.bf16.msra.mxu0 %v720_v14  ;;  %576 = vmatpush1.bf16.msra.mxu1 %v720_v14  ;;  %v530_v55 = vld [vmem:[%s981_s0 + $0xe8] sm:$0xff]  ;;  %v519_v57 = vld [vmem:[%s981_s0 + $0xb8] sm:$0xff]  ;;  %v529_v58 = vld [vmem:[%s981_s0 + $0xe0] sm:$0xff] }
  0x11   :  { %550 = vmatprep.subr.bf16.mxu0 %v648_v0  ;;  %577 = vmatprep.subr.bf16.mxu1 %v648_v0  ;;  %v532_v59 = vld [vmem:[%s981_s0 + $0xf8] sm:$0xff]  ;;  %v518_v60 = vld [vmem:[%s981_s0 + $0xb0] sm:$0xff]  ;;  %v946_v62 = vld [vmem:[%s982_s2] ss:$0 sm:$0xff] }
  0x12   :  { %v531_v61 = vld [vmem:[%s981_s0 + $0xf0] sm:$0xff] }
  0x14   :  { %552 = vmatpush1.bf16.msra.mxu0 %v732_v17  ;;  %579 = vmatpush1.bf16.msra.mxu1 %v732_v17 }
  0x15   :  { %553 = vmatprep.subr.bf16.mxu0 %v648_v0  ;;  %580 = vmatprep.subr.bf16.mxu1 %v648_v0 }
  0x18   :  { %555 = vmatpush1.bf16.msra.mxu0 %v744_v20  ;;  %582 = vmatpush1.bf16.msra.mxu1 %v744_v20 }
  0x19   :  { %556 = vmatprep.subr.bf16.mxu0 %v648_v0  ;;  %583 = vmatprep.subr.bf16.mxu1 %v648_v0 }
  0x1c   :  { %558 = vmatpush1.bf16.msra.mxu0 %v756_v23  ;;  %585 = vmatpush1.bf16.msra.mxu1 %v756_v23 }
  0x1d   :  { %559 = vmatprep.subr.bf16.mxu0 %v648_v0  ;;  %586 = vmatprep.subr.bf16.mxu1 %v648_v0 }
  0x20   :  { %561 = vmatpush1.bf16.msra.mxu0 %v768_v26  ;;  %588 = vmatpush1.bf16.msra.mxu1 %v768_v26 }
  0x21   :  { %562 = vmatprep.subr.bf16.mxu0 %v648_v0  ;;  %589 = vmatprep.subr.bf16.mxu1 %v648_v0 }
  0x24   :  { %564 = vmatpush1.bf16.msra.mxu0 %v780_v29  ;;  %591 = vmatpush1.bf16.msra.mxu1 %v780_v29 }
  0x25   :  { %101 = vmatprep.subr.mxu0 %v649_v30  ;;  %207 = vmatprep.subr.mxu1 %v649_v30 }
  0x28   :  { %494 = vmatpush1.msk.msra.mxu0 %vm61_vm1, %v790_v31  ;;  %507 = vmatpush1.msk.msra.mxu1 %vm61_vm1, %v790_v31 }
  0x29   :  { %130 = vmatmul.mubr.f32.vlgmr.msra.gmra.mrb[0].mxu0 %v34_v32  ;;  %592 = vmatprep.subr.bf16.mxu0 %v648_v0 }
  0x2a   :  { %236 = vmatmul.mubr.f32.vlgmr.msra.gmra.mrb[0].mxu1 %v499_v33  ;;  %594 = vmatpush1.bf16.msra.mxu0 %v681_v4 }
  0x2b   :  { %619 = vmatprep.subr.bf16.mxu1 %v648_v0  ;;  %595 = vmatprep.subr.bf16.mxu0 %v648_v0 }
  0x2c   :  { %621 = vmatpush1.bf16.msra.mxu1 %v681_v4  ;;  %496 = vmatprep.mubr.msk.f32.mxu0 %vm48_vm0, %v37_v34 }
  0x2d   :  { %622 = vmatprep.subr.bf16.mxu1 %v648_v0  ;;  %135 = vmatmul.mubr.f32.gmra.mrb[2].mxu0 %v36_v35 }
  0x2e   :  { %597 = vmatpush1.bf16.msra.mxu0 %v688_v6  ;;  %509 = vmatprep.mubr.msk.f32.mxu1 %vm48_vm0, %v502_v36 }
  0x2f   :  { %598 = vmatprep.subr.bf16.mxu0 %v648_v0  ;;  %241 = vmatmul.mubr.f32.gmra.mrb[2].mxu1 %v501_v37 }
  0x30   :  { %624 = vmatpush1.bf16.msra.mxu1 %v688_v6  ;;  %497 = vmatprep.mubr.msk.f32.mxu0 %vm48_vm0, %v39_v38 }
  0x31   :  { %625 = vmatprep.subr.bf16.mxu1 %v648_v0  ;;  %140 = vmatmul.mubr.f32.gmra.mrb[4].mxu0 %v38_v39 }
  0x32   :  { %600 = vmatpush1.bf16.msra.mxu0 %v703_v10  ;;  %510 = vmatprep.mubr.msk.f32.mxu1 %vm48_vm0, %v504_v40 }
  0x33   :  { %601 = vmatprep.subr.bf16.mxu0 %v648_v0  ;;  %246 = vmatmul.mubr.f32.gmra.mrb[4].mxu1 %v503_v41 }
  0x34   :  { %627 = vmatpush1.bf16.msra.mxu1 %v703_v10  ;;  %498 = vmatprep.mubr.msk.f32.mxu0 %vm48_vm0, %v41_v42 }
  0x35   :  { %628 = vmatprep.subr.bf16.mxu1 %v648_v0  ;;  %145 = vmatmul.mubr.f32.gmra.mrb[6].mxu0 %v40_v43 }
  0x36   :  { %603 = vmatpush1.bf16.msra.mxu0 %v720_v14  ;;  %511 = vmatprep.mubr.msk.f32.mxu1 %vm48_vm0, %v506_v44 }
  0x37   :  { %604 = vmatprep.subr.bf16.mxu0 %v648_v0  ;;  %251 = vmatmul.mubr.f32.gmra.mrb[6].mxu1 %v505_v45 }
  0x38   :  { %630 = vmatpush1.bf16.msra.mxu1 %v720_v14  ;;  %521 = vmatprep.mubr.msk.f32.mxu0 %vm48_vm0, %v513_v46 }
  0x39   :  { %631 = vmatprep.subr.bf16.mxu1 %v648_v0  ;;  %534 = vmatprep.mubr.msk.f32.mxu1 %vm48_vm0, %v526_v47 }
  0x3a   :  { %606 = vmatpush1.bf16.msra.mxu0 %v732_v17 }
  0x3b   :  { %607 = vmatprep.subr.bf16.mxu0 %v648_v0 }
  0x3c   :  { %633 = vmatpush1.bf16.msra.mxu1 %v732_v17 }
  0x3d   :  { %634 = vmatprep.subr.bf16.mxu1 %v648_v0 }
  0x3e   :  { %609 = vmatpush1.bf16.msra.mxu0 %v744_v20 }
  0x3f   :  { %610 = vmatprep.subr.bf16.mxu0 %v648_v0 }
  0x40   :  { %636 = vmatpush1.bf16.msra.mxu1 %v744_v20 }
  0x41   :  { %637 = vmatprep.subr.bf16.mxu1 %v648_v0 }
  0x42   :  { %612 = vmatpush1.bf16.msra.mxu0 %v756_v23 }
  0x43   :  { %613 = vmatprep.subr.bf16.mxu0 %v648_v0 }
  0x44   :  { %639 = vmatpush1.bf16.msra.mxu1 %v756_v23 }
  0x45   :  { %640 = vmatprep.subr.bf16.mxu1 %v648_v0 }
  0x46   :  { %615 = vmatpush1.bf16.msra.mxu0 %v768_v26 }
  0x47   :  { %616 = vmatprep.subr.bf16.mxu0 %v648_v0 }
  0x48   :  { %642 = vmatpush1.bf16.msra.mxu1 %v768_v26 }
  0x49   :  { %643 = vmatprep.subr.bf16.mxu1 %v648_v0 }
  0x4a   :  { %618 = vmatpush1.bf16.msra.mxu0 %v780_v29 }
  0x4b   :  { %317 = vmatprep.subr.mxu0 %v649_v30 }
  0x4c   :  { %645 = vmatpush1.bf16.msra.mxu1 %v780_v29 }
  0x4d   :  { %427 = vmatprep.subr.mxu1 %v649_v30 }
  0x4e   :  { %520 = vmatpush1.msk.msra.mxu0 %vm61_vm1, %v790_v31 }
  0x4f   :  { %346 = vmatmul.mubr.f32.vlgmr.msra.gmra.mrb[8].mxu0 %v512_v48 }
  0x50   :  { %533 = vmatpush1.msk.msra.mxu1 %vm61_vm1, %v790_v31  ;;  %522 = vmatprep.mubr.msk.f32.mxu0 %vm48_vm0, %v515_v49 }
  0x51   :  { %456 = vmatmul.mubr.f32.vlgmr.msra.gmra.mrb[8].mxu1 %v525_v50 }
  0x52   :  { %535 = vmatprep.mubr.msk.f32.mxu1 %vm48_vm0, %v528_v51 }
  0x53   :  { %351 = vmatmul.mubr.f32.gmra.mrb[10].mxu0 %v514_v52 }
  0x54   :  { %523 = vmatprep.mubr.msk.f32.mxu0 %vm48_vm0, %v517_v53 }
  0x55   :  { %461 = vmatmul.mubr.f32.gmra.mrb[10].mxu1 %v527_v54 }
  0x56   :  { %536 = vmatprep.mubr.msk.f32.mxu1 %vm48_vm0, %v530_v55 }
  0x57   :  { %356 = vmatmul.mubr.f32.gmra.mrb[12].mxu0 %v516_v56 }
  0x58   :  { %524 = vmatprep.mubr.msk.f32.mxu0 %vm48_vm0, %v519_v57 }
  0x59   :  { %466 = vmatmul.mubr.f32.gmra.mrb[12].mxu1 %v529_v58 }
  0x5a   :  { %537 = vmatprep.mubr.msk.f32.mxu1 %vm48_vm0, %v532_v59 }
  0x5b   :  { %361 = vmatmul.mubr.f32.gmra.mrb[14].mxu0 %v518_v60 }
  0x5d   :  { %471 = vmatmul.mubr.f32.gmra.mrb[14].mxu1 %v531_v61 }
  0xfc   :  { %v131_v63 = vpop.f32.mrb[0].mxu0 }
  0xfd   :  { %v132_v0 = vadd.f32 %v946_v62, %v131_v63  ;;  %v133_v1 = vpop.f32.mrb[1].mxu0  ;;  %v237_v2 = vpop.f32.mrb[0].mxu1 }
  0xfe   :  { %v238_v3 = vadd.f32 %v946_v62, %v237_v2  ;;  %v239_v4 = vpop.f32.mrb[1].mxu1 }
 0x100   :  { %v256_v5 = vmax.f32 %v132_v0, %v238_v3  ;;  %v136_v6 = vpop.f32.mrb[2].mxu0 }
 0x101   :  { %v137_v7 = vadd.f32 %v946_v62, %v136_v6  ;;  %v138_v8 = vpop.f32.mrb[3].mxu0 }
 0x102   :  { %v242_v9 = vpop.f32.mrb[2].mxu1 }
 0x103   :  { %v243_v10 = vadd.f32 %v946_v62, %v242_v9  ;;  %v244_v11 = vpop.f32.mrb[3].mxu1 }
 0x104   :  { %v141_v12 = vpop.f32.mrb[4].mxu0 }
 0x105   :  { %v257_v13 = vmax.f32 %v137_v7, %v243_v10  ;;  %v142_v14 = vadd.f32 %v946_v62, %v141_v12  ;;  %v143_v15 = vpop.f32.mrb[5].mxu0 }
 0x106   :  { %v247_v16 = vpop.f32.mrb[4].mxu1 }
 0x107   :  { %v248_v17 = vadd.f32 %v946_v62, %v247_v16  ;;  %v249_v18 = vpop.f32.mrb[5].mxu1 }
 0x108   :  { %v146_v19 = vpop.f32.mrb[6].mxu0 }
 0x109   :  { %v258_v20 = vmax.f32 %v142_v14, %v248_v17  ;;  %v147_v21 = vadd.f32 %v946_v62, %v146_v19  ;;  %v148_v22 = vpop.f32.mrb[7].mxu0 }
 0x10a   :  { %v252_v23 = vpop.f32.mrb[6].mxu1 }
 0x10b   :  { %v253_v24 = vadd.f32 %v946_v62, %v252_v23  ;;  %v254_v25 = vpop.f32.mrb[7].mxu1 }
 0x10d   :  { %v259_v26 = vmax.f32 %v147_v21, %v253_v24 }
 0x122   :  { %v347_v27 = vpop.f32.mrb[8].mxu0 }
 0x123   :  { %v348_v28 = vadd.f32 %v946_v62, %v347_v27  ;;  %v349_v29 = vpop.f32.mrb[9].mxu0 }
 0x124   :  { %v457_v30 = vpop.f32.mrb[8].mxu1 }
 0x125   :  { %v366_v31 = vmax.f32 %v256_v5, %v348_v28  ;;  %v458_v32 = vadd.f32 %v946_v62, %v457_v30  ;;  %v459_v33 = vpop.f32.mrb[9].mxu1 }
 0x126   :  { %v352_v34 = vpop.f32.mrb[10].mxu0 }
 0x127   :  { %v476_v35 = vmax.f32 %v366_v31, %v458_v32  ;;  %v353_v36 = vadd.f32 %v946_v62, %v352_v34  ;;  %v354_v37 = vpop.f32.mrb[11].mxu0 }
 0x128   :  { %v462_v38 = vpop.f32.mrb[10].mxu1 }
 0x129   :  { %v480_v39 = vmax.f32 %v476_v35, 0.0  ;;  %v367_v40 = vmax.f32 %v257_v13, %v353_v36  ;;  %v463_v41 = vadd.f32 %v946_v62, %v462_v38  ;;  %v464_v42 = vpop.f32.mrb[11].mxu1 }
 0x12a   :  { %v357_v43 = vpop.f32.mrb[12].mxu0 }
 0x12b   :  { %485 = vst.msk [vmem:[%s983_s3] sm:$0xff] %vm484_vm2, %v480_v39  ;;  %v477_v44 = vmax.f32 %v367_v40, %v463_v41  ;;  %v358_v45 = vadd.f32 %v946_v62, %v357_v43  ;;  %v359_v46 = vpop.f32.mrb[13].mxu0 }
 0x12c   :  { %v467_v47 = vpop.f32.mrb[12].mxu1 }
 0x12d   :  { %v481_v48 = vmax.f32 %v477_v44, 0.0  ;;  %v368_v49 = vmax.f32 %v258_v20, %v358_v45  ;;  %v468_v50 = vadd.f32 %v946_v62, %v467_v47  ;;  %v469_v51 = vpop.f32.mrb[13].mxu1 }
 0x12e   :  { %v362_v52 = vpop.f32.mrb[14].mxu0 }
 0x12f   :  { %486 = vst.msk [vmem:[%s983_s3 + $0x8] sm:$0xff] %vm484_vm2, %v481_v48  ;;  %v478_v53 = vmax.f32 %v368_v49, %v468_v50  ;;  %v363_v54 = vadd.f32 %v946_v62, %v362_v52  ;;  %v364_v55 = vpop.f32.mrb[15].mxu0 }
 0x130   :  { %v472_v56 = vpop.f32.mrb[14].mxu1 }
 0x131   :  { %v482_v57 = vmax.f32 %v478_v53, 0.0  ;;  %v369_v58 = vmax.f32 %v259_v26, %v363_v54  ;;  %v473_v59 = vadd.f32 %v946_v62, %v472_v56  ;;  %v474_v60 = vpop.f32.mrb[15].mxu1 }
 0x133   :  { %487 = vst.msk [vmem:[%s983_s3 + $0x10] sm:$0xff] %vm484_vm2, %v482_v57  ;;  %v479_v61 = vmax.f32 %v369_v58, %v473_v59 }
 0x135   :  { %v483_v63 = vmax.f32 %v479_v61, 0.0 }
 0x137   :  { %488 = vst.msk [vmem:[%s983_s3 + $0x18] sm:$0xff] %vm484_vm2, %v483_v63 }

</bundles_post_ra>
